<compile_context>
chip_gen: v7x
topology: tpu7x:2x2x1
jax: 0.10.0
libtpu: 0.0.40
codegen_flags: <defaults>
</compile_context>

<pallas_src>
import math
from functools import partial

import numpy as np
import jax
import jax.numpy as jnp
from jax.experimental import pallas as pl
from jax.experimental.pallas import tpu as pltpu

_INV_SQRT2 = 1.0 / math.sqrt(2.0)


# ----------------------------------------------------------------------------
# Trace-time constants: truncated DFT matrices.
#
# forward  (== rfft2(x, norm)[kept rows, :m2]):   X = F_H @ x @ G_F
# inverse  (== irfft2(zero-padded spectrum, s=(H,W), default "backward" norm)):
#            y = Re{ E_H @ S @ G_W }
# where the kept rows are k1 in [0, m1) U [H-m1, H) and the kept cols k2 in [0, m2).
# The Hermitian-doubling coefficients (1 for DC / Nyquist column, 2 otherwise)
# and the 1/(H*W) inverse normalisation are folded into G_W.
# ----------------------------------------------------------------------------
def _dft_matrices(H, W, m1, m2, norm):
    k1 = np.concatenate([np.arange(m1), np.arange(H - m1, H)]).astype(np.float64)
    k2 = np.arange(m2, dtype=np.float64)
    h = np.arange(H, dtype=np.float64)
    w = np.arange(W, dtype=np.float64)

    if norm == "ortho":
        fscale = 1.0 / math.sqrt(H * W)
    elif norm in (None, "backward"):
        fscale = 1.0
    elif norm == "forward":
        fscale = 1.0 / (H * W)
    else:
        raise ValueError(f"unsupported norm: {norm!r}")

    # forward DFT (e^{-i...}), rfft2 normalisation folded into the H factor
    ang_fh = 2.0 * np.pi * np.outer(k1, h) / H            # (2m1, H)
    fhr = np.cos(ang_fh) * fscale
    fhi = -np.sin(ang_fh) * fscale
    ang_fw = 2.0 * np.pi * np.outer(w, k2) / W            # (W, m2)
    gfr = np.cos(ang_fw)
    gfi = -np.sin(ang_fw)

    # inverse DFT (e^{+i...}), irfft2 "backward" normalisation 1/(H*W)
    ang_eh = 2.0 * np.pi * np.outer(h, k1) / H            # (H, 2m1)
    ehr = np.cos(ang_eh)
    ehi = np.sin(ang_eh)
    c = np.where(np.logical_or(k2 == 0,
                               np.logical_and(W % 2 == 0, k2 == (W // 2))),
                 1.0, 2.0)                                 # Hermitian doubling
    ang_gw = 2.0 * np.pi * np.outer(k2, w) / W             # (m2, W)
    iscale = 1.0 / (H * W)
    gwr = np.cos(ang_gw) * c[:, None] * iscale
    gwi = np.sin(ang_gw) * c[:, None] * iscale

    return tuple(jnp.asarray(a, dtype=jnp.float32)
                 for a in (fhr, fhi, gfr, gfi, ehr, ehi, gwr, gwi))


def _pick_channel_tile(co, max_tile=32):
    """Largest divisor of C_out not exceeding max_tile (bounds weight VMEM)."""
    if co <= max_tile:
        return co
    t = max_tile
    while co % t != 0:
        t -= 1
    return t


def _pick_hw_tile(hw, max_tile=4096):
    """Largest multiple of 128 that divides H*W, capped at max_tile."""
    if hw <= max_tile or hw % 128 != 0:
        return hw                     # full dim is always a legal block
    t = (max_tile // 128) * 128
    while hw % t != 0:
        t -= 128
    return t


# ----------------------------------------------------------------------------
# Kernel 1: fused spectral branch (per batch, per C_out tile)
#   forward truncated DFT of each input channel -> complex channel mixing
#   accumulated over C_in -> truncated inverse DFT per output channel.
# ----------------------------------------------------------------------------
def _spectral_kernel(x_ref, fhr_ref, fhi_ref, gfr_ref, gfi_ref,
                     ehr_ref, ehi_ref, gwr_ref, gwi_ref,
                     wr_ref, wsum_ref, wdif_ref,
                     y_ref, accr_ref, acci_ref):
    ci = x_ref.shape[1]
    co_t = y_ref.shape[1]

    accr_ref[...] = jnp.zeros_like(accr_ref)
    acci_ref[...] = jnp.zeros_like(acci_ref)

    fhr = fhr_ref[...]
    fhi = fhi_ref[...]
    gfr = gfr_ref[...]
    gfi = gfi_ref[...]

    # Forward truncated DFT + channel mixing, accumulated over C_in
    # (static unroll; only 2 x (co_t, 2m1, m2) accumulators stay live).
    for i in range(ci):
        xi = x_ref[0, i]                                              # (H, W)
        ar = jnp.dot(fhr, xi, preferred_element_type=jnp.float32)     # (2m1, W)
        ai = jnp.dot(fhi, xi, preferred_element_type=jnp.float32)
        xkr = (jnp.dot(ar, gfr, preferred_element_type=jnp.float32)
               - jnp.dot(ai, gfi, preferred_element_type=jnp.float32))  # (2m1, m2)
        xki = (jnp.dot(ar, gfi, preferred_element_type=jnp.float32)
               + jnp.dot(ai, gfr, preferred_element_type=jnp.float32))
        # 3-multiply complex product: wsum = wr+wi, wdif = wi-wr (precomputed).
        k = wr_ref[i] * (xkr + xki)[None, :, :]                       # (co_t, 2m1, m2)
        accr_ref[...] += k - xki[None, :, :] * wsum_ref[i]
        acci_ref[...] += k + xkr[None, :, :] * wdif_ref[i]

    ehr = ehr_ref[...]
    ehi = ehi_ref[...]
    gwr = gwr_ref[...]
    gwi = gwi_ref[...]

    # Truncated inverse DFT per output channel
    # (exactly irfft2 of the zero-padded spectrum with "backward" norm).
    for o in range(co_t):
        sr = accr_ref[o]
        si = acci_ref[o]
        pr = (jnp.dot(ehr, sr, preferred_element_type=jnp.float32)
              - jnp.dot(ehi, si, preferred_element_type=jnp.float32))  # (H, m2)
        pi = (jnp.dot(ehr, si, preferred_element_type=jnp.float32)
              + jnp.dot(ehi, sr, preferred_element_type=jnp.float32))
        y_ref[0, o] = (jnp.dot(pr, gwr, preferred_element_type=jnp.float32)
                       - jnp.dot(pi, gwi, preferred_element_type=jnp.float32))  # (H, W)


def spectral_branch(x, mats, wr, wsum, wdif, co_tile):
    fhr, fhi, gfr, gfi, ehr, ehi, gwr, gwi = mats
    B, Ci, H, W = x.shape
    Co = wr.shape[1]
    two_m1, m2 = wr.shape[2], wr.shape[3]
    n_co = Co // co_tile

    const_idx = lambda b, c: (0, 0)
    w_idx = lambda b, c: (0, c, 0, 0)

    return pl.pallas_call(
        _spectral_kernel,
        out_shape=jax.ShapeDtypeStruct((B, Co, H, W), jnp.float32),
        grid_spec=pltpu.PrefetchScalarGridSpec(
            num_scalar_prefetch=0,
            grid=(B, n_co),
            in_specs=[
                pl.BlockSpec((1, Ci, H, W), lambda b, c: (b, 0, 0, 0)),
                pl.BlockSpec((two_m1, H), const_idx),
                pl.BlockSpec((two_m1, H), const_idx),
                pl.BlockSpec((W, m2), const_idx),
                pl.BlockSpec((W, m2), const_idx),
                pl.BlockSpec((H, two_m1), const_idx),
                pl.BlockSpec((H, two_m1), const_idx),
                pl.BlockSpec((m2, W), const_idx),
                pl.BlockSpec((m2, W), const_idx),
                pl.BlockSpec((Ci, co_tile, two_m1, m2), w_idx),
                pl.BlockSpec((Ci, co_tile, two_m1, m2), w_idx),
                pl.BlockSpec((Ci, co_tile, two_m1, m2), w_idx),
            ],
            out_specs=pl.BlockSpec((1, co_tile, H, W), lambda b, c: (b, c, 0, 0)),
            scratch_shapes=[pltpu.VMEM((co_tile, two_m1, m2), jnp.float32),
                            pltpu.VMEM((co_tile, two_m1, m2), jnp.float32)],
        ),
        compiler_params=pltpu.CompilerParams(
            dimension_semantics=("parallel", "parallel")),
    )(x, fhr, fhi, gfr, gfi, ehr, ehi, gwr, gwi, wr, wsum, wdif)


# ----------------------------------------------------------------------------
# Kernel 2: fused 1x1-conv residual + add + exact (erf) GELU, tiled over H*W.
#   x_flat: (B, C_in, HW), y_flat: (B, C_out, HW)  -> out (B, C_out, HW)
# ----------------------------------------------------------------------------
def _res_gelu_kernel(x_ref, y_ref, w_ref, b_ref, o_ref):
    res = jnp.dot(w_ref[...], x_ref[0],
                  preferred_element_type=jnp.float32) + b_ref[...]   # (Co, T)
    z = y_ref[0] + res
    o_ref[0] = 0.5 * z * (1.0 + jax.lax.erf(z * _INV_SQRT2))


def residual_add_gelu(x_flat, y_flat, w_lin, b_lin, tile_hw):
    B, Ci, HW = x_flat.shape
    Co = w_lin.shape[0]
    n_t = HW // tile_hw
    return pl.pallas_call(
        _res_gelu_kernel,
        out_shape=jax.ShapeDtypeStruct((B, Co, HW), jnp.float32),
        grid_spec=pltpu.PrefetchScalarGridSpec(
            num_scalar_prefetch=0,
            grid=(B, n_t),
            in_specs=[
                pl.BlockSpec((1, Ci, tile_hw), lambda b, t: (b, 0, t)),
                pl.BlockSpec((1, Co, tile_hw), lambda b, t: (b, 0, t)),
                pl.BlockSpec((Co, Ci), lambda b, t: (0, 0)),
                pl.BlockSpec((Co, 1), lambda b, t: (0, 0)),
            ],
            out_specs=pl.BlockSpec((1, Co, tile_hw), lambda b, t: (b, 0, t)),
        ),
        compiler_params=pltpu.CompilerParams(
            dimension_semantics=("parallel", "parallel")),
    )(x_flat, y_flat, w_lin, b_lin)


# ----------------------------------------------------------------------------
# Full forward pass
# ----------------------------------------------------------------------------
@partial(jax.jit, static_argnames=("modes", "norm"))
def spectral_conv2d_forward(x, w_lin, b_lin, w1r, w1i, w2r, w2i, *, modes, norm="ortho"):
    B, Ci, H, W = x.shape
    Co = w_lin.shape[0]
    m1, m2 = modes
    assert 2 * m1 <= H, "frequency corners overlap (modes1 > H/2)"
    assert m2 <= W // 2 + 1, "modes2 exceeds rfft width"

    mats = _dft_matrices(H, W, m1, m2, norm)

    # weights1 || weights2 along the kept-row axis -> (Ci, Co, 2*m1, m2),
    # plus the 3-multiply-complex precomputes (loop-invariant).
    wr = jnp.concatenate([w1r, w2r], axis=2).astype(jnp.float32)
    wi = jnp.concatenate([w1i, w2i], axis=2).astype(jnp.float32)
    wsum = wr + wi
    wdif = wi - wr

    x32 = x.astype(jnp.float32)
    co_tile = _pick_channel_tile(Co)
    y = spectral_branch(x32, mats, wr, wsum, wdif, co_tile)          # (B, Co, H, W)

    HW = H * W
    tile_hw = _pick_hw_tile(HW)
    out = residual_add_gelu(x32.reshape(B, Ci, HW),
                            y.reshape(B, Co, HW),
                            w_lin.astype(jnp.float32),
                            b_lin.astype(jnp.float32),
                            tile_hw)                                  # (B, Co, HW)
    return out.reshape(B, Co, H, W)


# ----------------------------------------------------------------------------
# Pure-JAX reference (FFT-based, mirrors the PyTorch module exactly)
# ----------------------------------------------------------------------------
def reference_forward(x, w_lin, b_lin, w1r, w1i, w2r, w2i, modes, norm="ortho"):
    B, Ci, H, W = x.shape
    Co = w_lin.shape[0]
    m1, m2 = modes
    res = jnp.einsum("oi,bihw->bohw", w_lin, x) + b_lin.reshape(1, Co, 1, 1)
    x_ft = jnp.fft.rfft2(x, norm=norm)
    w1 = (w1r + 1j * w1i).astype(jnp.complex64)
    w2 = (w2r + 1j * w2i).astype(jnp.complex64)
    out_ft = jnp.zeros((B, Co, H, W // 2 + 1), dtype=jnp.complex64)
    out_ft = out_ft.at[:, :, :m1, :m2].set(
        jnp.einsum("bixy,ioxy->boxy", x_ft[:, :, :m1, :m2], w1))
    out_ft = out_ft.at[:, :, H - m1:, :m2].set(
        jnp.einsum("bixy,ioxy->boxy", x_ft[:, :, H - m1:, :m2], w2))
    # NOTE: the PyTorch module calls irfft2 WITHOUT a norm argument.
    y = jnp.fft.irfft2(out_ft, s=(H, W))
    z = y + res
    return 0.5 * z * (1.0 + jax.lax.erf(z / math.sqrt(2.0)))


if __name__ == "__main__":
    B, C_in, C_out = 2, 4, 4
    H, W = 16, 16
    modes = (4, 4)            # modes1 <= H/2, modes2 <= W//2 + 1

    key = jax.random.PRNGKey(0)
    k_x, k_w, k_b, k_1r, k_1i, k_2r, k_2i = jax.random.split(key, 7)

    x = jax.random.normal(k_x, (B, C_in, H, W), dtype=jnp.float32)

    # nn.Conv2d(in_dim, out_dim, 1) parameters.
    bound = 1.0 / math.sqrt(C_in)
    w_lin = jax.random.uniform(k_w, (C_out, C_in), jnp.float32, -bound, bound)
    b_lin = jax.random.uniform(k_b, (C_out, 1), jnp.float32, -bound, bound)

    # weights1 / weights2 = scale * rand(complex)  -> real & imag in [0, scale)
    scale = 1.0 / (C_in * C_out)
    m1, m2 = modes
    w1r = scale * jax.random.uniform(k_1r, (C_in, C_out, m1, m2), jnp.float32)
    w1i = scale * jax.random.uniform(k_1i, (C_in, C_out, m1, m2), jnp.float32)
    w2r = scale * jax.random.uniform(k_2r, (C_in, C_out, m1, m2), jnp.float32)
    w2i = scale * jax.random.uniform(k_2i, (C_in, C_out, m1, m2), jnp.float32)

    out = spectral_conv2d_forward(x, w_lin, b_lin, w1r, w1i, w2r, w2i, modes=modes)
    out = jax.block_until_ready(out)

    ref = jax.block_until_ready(
        reference_forward(x, w_lin, b_lin, w1r, w1i, w2r, w2i, modes))

    assert out.shape == (B, C_out, H, W)
    assert jnp.allclose(out, ref, atol=1e-3, rtol=1e-3), (
        float(jnp.max(jnp.abs(out - ref))))

    print("KERNEL_OK")
</pallas_src>

<mosaic_0001>
module attributes {stable_mosaic.version = 11 : i64} {
  func.func @_spectral_kernel(%arg0: i32, %arg1: i32, %arg2: memref<1x4x16x16xf32, #tpu.memory_space<vmem>>, %arg3: memref<8x16xf32, #tpu.memory_space<vmem>>, %arg4: memref<8x16xf32, #tpu.memory_space<vmem>>, %arg5: memref<16x4xf32, #tpu.memory_space<vmem>>, %arg6: memref<16x4xf32, #tpu.memory_space<vmem>>, %arg7: memref<16x8xf32, #tpu.memory_space<vmem>>, %arg8: memref<16x8xf32, #tpu.memory_space<vmem>>, %arg9: memref<4x16xf32, #tpu.memory_space<vmem>>, %arg10: memref<4x16xf32, #tpu.memory_space<vmem>>, %arg11: memref<4x4x8x4xf32, #tpu.memory_space<vmem>>, %arg12: memref<4x4x8x4xf32, #tpu.memory_space<vmem>>, %arg13: memref<4x4x8x4xf32, #tpu.memory_space<vmem>>, %arg14: memref<1x4x16x16xf32, #tpu.memory_space<vmem>>, %arg15: memref<4x8x4xf32, #tpu.memory_space<vmem>>, %arg16: memref<4x8x4xf32, #tpu.memory_space<vmem>>) attributes {dimension_semantics = [#tpu.dimension_semantics<parallel>, #tpu.dimension_semantics<parallel>], iteration_bounds = array<i64: 2, 1>, scalar_prefetch = 0 : i64, scratch_operands = 2 : i64, tpu.core_type = #tpu.core_type<tc>, window_params = [{transform_indices = @transform_0, window_bounds = array<i64: 1, 4, 16, 16>}, {pipeline_mode = #tpu.pipeline_mode<synchronous>, transform_indices = @transform_1, window_bounds = array<i64: 8, 16>}, {pipeline_mode = #tpu.pipeline_mode<synchronous>, transform_indices = @transform_2, window_bounds = array<i64: 8, 16>}, {pipeline_mode = #tpu.pipeline_mode<synchronous>, transform_indices = @transform_3, window_bounds = array<i64: 16, 4>}, {pipeline_mode = #tpu.pipeline_mode<synchronous>, transform_indices = @transform_4, window_bounds = array<i64: 16, 4>}, {pipeline_mode = #tpu.pipeline_mode<synchronous>, transform_indices = @transform_5, window_bounds = array<i64: 16, 8>}, {pipeline_mode = #tpu.pipeline_mode<synchronous>, transform_indices = @transform_6, window_bounds = array<i64: 16, 8>}, {pipeline_mode = #tpu.pipeline_mode<synchronous>, transform_indices = @transform_7, window_bounds = array<i64: 4, 16>}, {pipeline_mode = #tpu.pipeline_mode<synchronous>, transform_indices = @transform_8, window_bounds = array<i64: 4, 16>}, {transform_indices = @transform_9, window_bounds = array<i64: 4, 4, 8, 4>}, {transform_indices = @transform_10, window_bounds = array<i64: 4, 4, 8, 4>}, {transform_indices = @transform_11, window_bounds = array<i64: 4, 4, 8, 4>}, {transform_indices = @transform_12, window_bounds = array<i64: 1, 4, 16, 16>}]} {
    %cst = arith.constant 0.000000e+00 : f32
    %0 = vector.broadcast %cst : f32 to vector<4x8x4xf32>
    %c0 = arith.constant 0 : index
    %c0_0 = arith.constant 0 : index
    %c0_1 = arith.constant 0 : index
    %1 = vector.load %arg15[%c0, %c0_0, %c0_1] : memref<4x8x4xf32, #tpu.memory_space<vmem>>, vector<4x8x4xf32>
    tpu.vector_store %arg15[%c0, %c0_0, %c0_1], %0 {strides = array<i32>} : memref<4x8x4xf32, #tpu.memory_space<vmem>>, vector<4x8x4xf32>,
    %cst_2 = arith.constant 0.000000e+00 : f32
    %2 = vector.broadcast %cst_2 : f32 to vector<4x8x4xf32>
    %c0_3 = arith.constant 0 : index
    %c0_4 = arith.constant 0 : index
    %c0_5 = arith.constant 0 : index
    %3 = vector.load %arg16[%c0_3, %c0_4, %c0_5] : memref<4x8x4xf32, #tpu.memory_space<vmem>>, vector<4x8x4xf32>
    tpu.vector_store %arg16[%c0_3, %c0_4, %c0_5], %2 {strides = array<i32>} : memref<4x8x4xf32, #tpu.memory_space<vmem>>, vector<4x8x4xf32>,
    %c0_6 = arith.constant 0 : index
    %c0_7 = arith.constant 0 : index
    %4 = vector.load %arg3[%c0_6, %c0_7] : memref<8x16xf32, #tpu.memory_space<vmem>>, vector<8x16xf32>
    %c0_8 = arith.constant 0 : index
    %c0_9 = arith.constant 0 : index
    %5 = vector.load %arg4[%c0_8, %c0_9] : memref<8x16xf32, #tpu.memory_space<vmem>>, vector<8x16xf32>
    %c0_10 = arith.constant 0 : index
    %c0_11 = arith.constant 0 : index
    %6 = vector.load %arg5[%c0_10, %c0_11] : memref<16x4xf32, #tpu.memory_space<vmem>>, vector<16x4xf32>
    %c0_12 = arith.constant 0 : index
    %c0_13 = arith.constant 0 : index
    %7 = vector.load %arg6[%c0_12, %c0_13] : memref<16x4xf32, #tpu.memory_space<vmem>>, vector<16x4xf32>
    %c0_14 = arith.constant 0 : index
    %c0_15 = arith.constant 0 : index
    %c0_16 = arith.constant 0 : index
    %c0_17 = arith.constant 0 : index
    %8 = vector.load %arg2[%c0_14, %c0_15, %c0_16, %c0_17] : memref<1x4x16x16xf32, #tpu.memory_space<vmem>>, vector<1x1x16x16xf32>
    %9 = vector.shape_cast %8 : vector<1x1x16x16xf32> to vector<16x16xf32>
    %cst_18 = arith.constant dense<0.000000e+00> : vector<8x16xf32>
    %10 = tpu.matmul %4, %9, %cst_18 {dimension_numbers = #tpu.dot_dimension_numbers<[1], [0], [0], [1], [0, 0, 1, 1], [], []>} : vector<8x16xf32>, vector<16x16xf32>, vector<8x16xf32> -> vector<8x16xf32>
    %cst_19 = arith.constant dense<0.000000e+00> : vector<8x16xf32>
    %11 = tpu.matmul %5, %9, %cst_19 {dimension_numbers = #tpu.dot_dimension_numbers<[1], [0], [0], [1], [0, 0, 1, 1], [], []>} : vector<8x16xf32>, vector<16x16xf32>, vector<8x16xf32> -> vector<8x16xf32>
    %cst_20 = arith.constant dense<0.000000e+00> : vector<8x4xf32>
    %12 = tpu.matmul %10, %6, %cst_20 {dimension_numbers = #tpu.dot_dimension_numbers<[1], [0], [0], [1], [0, 0, 1, 1], [], []>} : vector<8x16xf32>, vector<16x4xf32>, vector<8x4xf32> -> vector<8x4xf32>
    %cst_21 = arith.constant dense<0.000000e+00> : vector<8x4xf32>
    %13 = tpu.matmul %11, %7, %cst_21 {dimension_numbers = #tpu.dot_dimension_numbers<[1], [0], [0], [1], [0, 0, 1, 1], [], []>} : vector<8x16xf32>, vector<16x4xf32>, vector<8x4xf32> -> vector<8x4xf32>
    %14 = arith.subf %12, %13 : vector<8x4xf32>
    %cst_22 = arith.constant dense<0.000000e+00> : vector<8x4xf32>
    %15 = tpu.matmul %10, %7, %cst_22 {dimension_numbers = #tpu.dot_dimension_numbers<[1], [0], [0], [1], [0, 0, 1, 1], [], []>} : vector<8x16xf32>, vector<16x4xf32>, vector<8x4xf32> -> vector<8x4xf32>
    %cst_23 = arith.constant dense<0.000000e+00> : vector<8x4xf32>
    %16 = tpu.matmul %11, %6, %cst_23 {dimension_numbers = #tpu.dot_dimension_numbers<[1], [0], [0], [1], [0, 0, 1, 1], [], []>} : vector<8x16xf32>, vector<16x4xf32>, vector<8x4xf32> -> vector<8x4xf32>
    %17 = arith.addf %15, %16 : vector<8x4xf32>
    %c0_24 = arith.constant 0 : index
    %c0_25 = arith.constant 0 : index
    %c0_26 = arith.constant 0 : index
    %c0_27 = arith.constant 0 : index
    %18 = vector.load %arg11[%c0_24, %c0_25, %c0_26, %c0_27] : memref<4x4x8x4xf32, #tpu.memory_space<vmem>>, vector<1x4x8x4xf32>
    %19 = vector.shape_cast %18 : vector<1x4x8x4xf32> to vector<4x8x4xf32>
    %20 = arith.addf %14, %17 : vector<8x4xf32>
    %21 = vector.shape_cast %20 : vector<8x4xf32> to vector<1x8x4xf32>
    %22 = vector.broadcast %21 : vector<1x8x4xf32> to vector<4x8x4xf32>
    %23 = arith.mulf %19, %22 : vector<4x8x4xf32>
    %c0_28 = arith.constant 0 : index
    %c0_29 = arith.constant 0 : index
    %c0_30 = arith.constant 0 : index
    %24 = vector.load %arg15[%c0_28, %c0_29, %c0_30] : memref<4x8x4xf32, #tpu.memory_space<vmem>>, vector<4x8x4xf32>
    %25 = vector.shape_cast %17 : vector<8x4xf32> to vector<1x8x4xf32>
    %c0_31 = arith.constant 0 : index
    %c0_32 = arith.constant 0 : index
    %c0_33 = arith.constant 0 : index
    %c0_34 = arith.constant 0 : index
    %26 = vector.load %arg12[%c0_31, %c0_32, %c0_33, %c0_34] : memref<4x4x8x4xf32, #tpu.memory_space<vmem>>, vector<1x4x8x4xf32>
    %27 = vector.shape_cast %26 : vector<1x4x8x4xf32> to vector<4x8x4xf32>
    %28 = vector.broadcast %25 : vector<1x8x4xf32> to vector<4x8x4xf32>
    %29 = arith.mulf %28, %27 : vector<4x8x4xf32>
    %30 = arith.subf %23, %29 : vector<4x8x4xf32>
    %31 = arith.addf %24, %30 : vector<4x8x4xf32>
    %c0_35 = arith.constant 0 : index
    %c0_36 = arith.constant 0 : index
    %c0_37 = arith.constant 0 : index
    %32 = vector.load %arg15[%c0_35, %c0_36, %c0_37] : memref<4x8x4xf32, #tpu.memory_space<vmem>>, vector<4x8x4xf32>
    tpu.vector_store %arg15[%c0_35, %c0_36, %c0_37], %31 {strides = array<i32>} : memref<4x8x4xf32, #tpu.memory_space<vmem>>, vector<4x8x4xf32>,
    %c0_38 = arith.constant 0 : index
    %c0_39 = arith.constant 0 : index
    %c0_40 = arith.constant 0 : index
    %33 = vector.load %arg16[%c0_38, %c0_39, %c0_40] : memref<4x8x4xf32, #tpu.memory_space<vmem>>, vector<4x8x4xf32>
    %34 = vector.shape_cast %14 : vector<8x4xf32> to vector<1x8x4xf32>
    %c0_41 = arith.constant 0 : index
    %c0_42 = arith.constant 0 : index
    %c0_43 = arith.constant 0 : index
    %c0_44 = arith.constant 0 : index
    %35 = vector.load %arg13[%c0_41, %c0_42, %c0_43, %c0_44] : memref<4x4x8x4xf32, #tpu.memory_space<vmem>>, vector<1x4x8x4xf32>
    %36 = vector.shape_cast %35 : vector<1x4x8x4xf32> to vector<4x8x4xf32>
    %37 = vector.broadcast %34 : vector<1x8x4xf32> to vector<4x8x4xf32>
    %38 = arith.mulf %37, %36 : vector<4x8x4xf32>
    %39 = arith.addf %23, %38 : vector<4x8x4xf32>
    %40 = arith.addf %33, %39 : vector<4x8x4xf32>
    %c0_45 = arith.constant 0 : index
    %c0_46 = arith.constant 0 : index
    %c0_47 = arith.constant 0 : index
    %41 = vector.load %arg16[%c0_45, %c0_46, %c0_47] : memref<4x8x4xf32, #tpu.memory_space<vmem>>, vector<4x8x4xf32>
    tpu.vector_store %arg16[%c0_45, %c0_46, %c0_47], %40 {strides = array<i32>} : memref<4x8x4xf32, #tpu.memory_space<vmem>>, vector<4x8x4xf32>,
    %c0_48 = arith.constant 0 : index
    %c1 = arith.constant 1 : index
    %c0_49 = arith.constant 0 : index
    %c0_50 = arith.constant 0 : index
    %42 = vector.load %arg2[%c0_48, %c1, %c0_49, %c0_50] : memref<1x4x16x16xf32, #tpu.memory_space<vmem>>, vector<1x1x16x16xf32>
    %43 = vector.shape_cast %42 : vector<1x1x16x16xf32> to vector<16x16xf32>
    %cst_51 = arith.constant dense<0.000000e+00> : vector<8x16xf32>
    %44 = tpu.matmul %4, %43, %cst_51 {dimension_numbers = #tpu.dot_dimension_numbers<[1], [0], [0], [1], [0, 0, 1, 1], [], []>} : vector<8x16xf32>, vector<16x16xf32>, vector<8x16xf32> -> vector<8x16xf32>
    %cst_52 = arith.constant dense<0.000000e+00> : vector<8x16xf32>
    %45 = tpu.matmul %5, %43, %cst_52 {dimension_numbers = #tpu.dot_dimension_numbers<[1], [0], [0], [1], [0, 0, 1, 1], [], []>} : vector<8x16xf32>, vector<16x16xf32>, vector<8x16xf32> -> vector<8x16xf32>
    %cst_53 = arith.constant dense<0.000000e+00> : vector<8x4xf32>
    %46 = tpu.matmul %44, %6, %cst_53 {dimension_numbers = #tpu.dot_dimension_numbers<[1], [0], [0], [1], [0, 0, 1, 1], [], []>} : vector<8x16xf32>, vector<16x4xf32>, vector<8x4xf32> -> vector<8x4xf32>
    %cst_54 = arith.constant dense<0.000000e+00> : vector<8x4xf32>
    %47 = tpu.matmul %45, %7, %cst_54 {dimension_numbers = #tpu.dot_dimension_numbers<[1], [0], [0], [1], [0, 0, 1, 1], [], []>} : vector<8x16xf32>, vector<16x4xf32>, vector<8x4xf32> -> vector<8x4xf32>
    %48 = arith.subf %46, %47 : vector<8x4xf32>
    %cst_55 = arith.constant dense<0.000000e+00> : vector<8x4xf32>
    %49 = tpu.matmul %44, %7, %cst_55 {dimension_numbers = #tpu.dot_dimension_numbers<[1], [0], [0], [1], [0, 0, 1, 1], [], []>} : vector<8x16xf32>, vector<16x4xf32>, vector<8x4xf32> -> vector<8x4xf32>
    %cst_56 = arith.constant dense<0.000000e+00> : vector<8x4xf32>
    %50 = tpu.matmul %45, %6, %cst_56 {dimension_numbers = #tpu.dot_dimension_numbers<[1], [0], [0], [1], [0, 0, 1, 1], [], []>} : vector<8x16xf32>, vector<16x4xf32>, vector<8x4xf32> -> vector<8x4xf32>
    %51 = arith.addf %49, %50 : vector<8x4xf32>
    %c1_57 = arith.constant 1 : index
    %c0_58 = arith.constant 0 : index
    %c0_59 = arith.constant 0 : index
    %c0_60 = arith.constant 0 : index
    %52 = vector.load %arg11[%c1_57, %c0_58, %c0_59, %c0_60] : memref<4x4x8x4xf32, #tpu.memory_space<vmem>>, vector<1x4x8x4xf32>
    %53 = vector.shape_cast %52 : vector<1x4x8x4xf32> to vector<4x8x4xf32>
    %54 = arith.addf %48, %51 : vector<8x4xf32>
    %55 = vector.shape_cast %54 : vector<8x4xf32> to vector<1x8x4xf32>
    %56 = vector.broadcast %55 : vector<1x8x4xf32> to vector<4x8x4xf32>
    %57 = arith.mulf %53, %56 : vector<4x8x4xf32>
    %c0_61 = arith.constant 0 : index
    %c0_62 = arith.constant 0 : index
    %c0_63 = arith.constant 0 : index
    %58 = vector.load %arg15[%c0_61, %c0_62, %c0_63] : memref<4x8x4xf32, #tpu.memory_space<vmem>>, vector<4x8x4xf32>
    %59 = vector.shape_cast %51 : vector<8x4xf32> to vector<1x8x4xf32>
    %c1_64 = arith.constant 1 : index
    %c0_65 = arith.constant 0 : index
    %c0_66 = arith.constant 0 : index
    %c0_67 = arith.constant 0 : index
    %60 = vector.load %arg12[%c1_64, %c0_65, %c0_66, %c0_67] : memref<4x4x8x4xf32, #tpu.memory_space<vmem>>, vector<1x4x8x4xf32>
    %61 = vector.shape_cast %60 : vector<1x4x8x4xf32> to vector<4x8x4xf32>
    %62 = vector.broadcast %59 : vector<1x8x4xf32> to vector<4x8x4xf32>
    %63 = arith.mulf %62, %61 : vector<4x8x4xf32>
    %64 = arith.subf %57, %63 : vector<4x8x4xf32>
    %65 = arith.addf %58, %64 : vector<4x8x4xf32>
    %c0_68 = arith.constant 0 : index
    %c0_69 = arith.constant 0 : index
    %c0_70 = arith.constant 0 : index
    %66 = vector.load %arg15[%c0_68, %c0_69, %c0_70] : memref<4x8x4xf32, #tpu.memory_space<vmem>>, vector<4x8x4xf32>
    tpu.vector_store %arg15[%c0_68, %c0_69, %c0_70], %65 {strides = array<i32>} : memref<4x8x4xf32, #tpu.memory_space<vmem>>, vector<4x8x4xf32>,
    %c0_71 = arith.constant 0 : index
    %c0_72 = arith.constant 0 : index
    %c0_73 = arith.constant 0 : index
    %67 = vector.load %arg16[%c0_71, %c0_72, %c0_73] : memref<4x8x4xf32, #tpu.memory_space<vmem>>, vector<4x8x4xf32>
    %68 = vector.shape_cast %48 : vector<8x4xf32> to vector<1x8x4xf32>
    %c1_74 = arith.constant 1 : index
    %c0_75 = arith.constant 0 : index
    %c0_76 = arith.constant 0 : index
    %c0_77 = arith.constant 0 : index
    %69 = vector.load %arg13[%c1_74, %c0_75, %c0_76, %c0_77] : memref<4x4x8x4xf32, #tpu.memory_space<vmem>>, vector<1x4x8x4xf32>
    %70 = vector.shape_cast %69 : vector<1x4x8x4xf32> to vector<4x8x4xf32>
    %71 = vector.broadcast %68 : vector<1x8x4xf32> to vector<4x8x4xf32>
    %72 = arith.mulf %71, %70 : vector<4x8x4xf32>
    %73 = arith.addf %57, %72 : vector<4x8x4xf32>
    %74 = arith.addf %67, %73 : vector<4x8x4xf32>
    %c0_78 = arith.constant 0 : index
    %c0_79 = arith.constant 0 : index
    %c0_80 = arith.constant 0 : index
    %75 = vector.load %arg16[%c0_78, %c0_79, %c0_80] : memref<4x8x4xf32, #tpu.memory_space<vmem>>, vector<4x8x4xf32>
    tpu.vector_store %arg16[%c0_78, %c0_79, %c0_80], %74 {strides = array<i32>} : memref<4x8x4xf32, #tpu.memory_space<vmem>>, vector<4x8x4xf32>,
    %c0_81 = arith.constant 0 : index
    %c2 = arith.constant 2 : index
    %c0_82 = arith.constant 0 : index
    %c0_83 = arith.constant 0 : index
    %76 = vector.load %arg2[%c0_81, %c2, %c0_82, %c0_83] : memref<1x4x16x16xf32, #tpu.memory_space<vmem>>, vector<1x1x16x16xf32>
    %77 = vector.shape_cast %76 : vector<1x1x16x16xf32> to vector<16x16xf32>
    %cst_84 = arith.constant dense<0.000000e+00> : vector<8x16xf32>
    %78 = tpu.matmul %4, %77, %cst_84 {dimension_numbers = #tpu.dot_dimension_numbers<[1], [0], [0], [1], [0, 0, 1, 1], [], []>} : vector<8x16xf32>, vector<16x16xf32>, vector<8x16xf32> -> vector<8x16xf32>
    %cst_85 = arith.constant dense<0.000000e+00> : vector<8x16xf32>
    %79 = tpu.matmul %5, %77, %cst_85 {dimension_numbers = #tpu.dot_dimension_numbers<[1], [0], [0], [1], [0, 0, 1, 1], [], []>} : vector<8x16xf32>, vector<16x16xf32>, vector<8x16xf32> -> vector<8x16xf32>
    %cst_86 = arith.constant dense<0.000000e+00> : vector<8x4xf32>
    %80 = tpu.matmul %78, %6, %cst_86 {dimension_numbers = #tpu.dot_dimension_numbers<[1], [0], [0], [1], [0, 0, 1, 1], [], []>} : vector<8x16xf32>, vector<16x4xf32>, vector<8x4xf32> -> vector<8x4xf32>
    %cst_87 = arith.constant dense<0.000000e+00> : vector<8x4xf32>
    %81 = tpu.matmul %79, %7, %cst_87 {dimension_numbers = #tpu.dot_dimension_numbers<[1], [0], [0], [1], [0, 0, 1, 1], [], []>} : vector<8x16xf32>, vector<16x4xf32>, vector<8x4xf32> -> vector<8x4xf32>
    %82 = arith.subf %80, %81 : vector<8x4xf32>
    %cst_88 = arith.constant dense<0.000000e+00> : vector<8x4xf32>
    %83 = tpu.matmul %78, %7, %cst_88 {dimension_numbers = #tpu.dot_dimension_numbers<[1], [0], [0], [1], [0, 0, 1, 1], [], []>} : vector<8x16xf32>, vector<16x4xf32>, vector<8x4xf32> -> vector<8x4xf32>
    %cst_89 = arith.constant dense<0.000000e+00> : vector<8x4xf32>
    %84 = tpu.matmul %79, %6, %cst_89 {dimension_numbers = #tpu.dot_dimension_numbers<[1], [0], [0], [1], [0, 0, 1, 1], [], []>} : vector<8x16xf32>, vector<16x4xf32>, vector<8x4xf32> -> vector<8x4xf32>
    %85 = arith.addf %83, %84 : vector<8x4xf32>
    %c2_90 = arith.constant 2 : index
    %c0_91 = arith.constant 0 : index
    %c0_92 = arith.constant 0 : index
    %c0_93 = arith.constant 0 : index
    %86 = vector.load %arg11[%c2_90, %c0_91, %c0_92, %c0_93] : memref<4x4x8x4xf32, #tpu.memory_space<vmem>>, vector<1x4x8x4xf32>
    %87 = vector.shape_cast %86 : vector<1x4x8x4xf32> to vector<4x8x4xf32>
    %88 = arith.addf %82, %85 : vector<8x4xf32>
    %89 = vector.shape_cast %88 : vector<8x4xf32> to vector<1x8x4xf32>
    %90 = vector.broadcast %89 : vector<1x8x4xf32> to vector<4x8x4xf32>
    %91 = arith.mulf %87, %90 : vector<4x8x4xf32>
    %c0_94 = arith.constant 0 : index
    %c0_95 = arith.constant 0 : index
    %c0_96 = arith.constant 0 : index
    %92 = vector.load %arg15[%c0_94, %c0_95, %c0_96] : memref<4x8x4xf32, #tpu.memory_space<vmem>>, vector<4x8x4xf32>
    %93 = vector.shape_cast %85 : vector<8x4xf32> to vector<1x8x4xf32>
    %c2_97 = arith.constant 2 : index
    %c0_98 = arith.constant 0 : index
    %c0_99 = arith.constant 0 : index
    %c0_100 = arith.constant 0 : index
    %94 = vector.load %arg12[%c2_97, %c0_98, %c0_99, %c0_100] : memref<4x4x8x4xf32, #tpu.memory_space<vmem>>, vector<1x4x8x4xf32>
    %95 = vector.shape_cast %94 : vector<1x4x8x4xf32> to vector<4x8x4xf32>
    %96 = vector.broadcast %93 : vector<1x8x4xf32> to vector<4x8x4xf32>
    %97 = arith.mulf %96, %95 : vector<4x8x4xf32>
    %98 = arith.subf %91, %97 : vector<4x8x4xf32>
    %99 = arith.addf %92, %98 : vector<4x8x4xf32>
    %c0_101 = arith.constant 0 : index
    %c0_102 = arith.constant 0 : index
    %c0_103 = arith.constant 0 : index
    %100 = vector.load %arg15[%c0_101, %c0_102, %c0_103] : memref<4x8x4xf32, #tpu.memory_space<vmem>>, vector<4x8x4xf32>
    tpu.vector_store %arg15[%c0_101, %c0_102, %c0_103], %99 {strides = array<i32>} : memref<4x8x4xf32, #tpu.memory_space<vmem>>, vector<4x8x4xf32>,
    %c0_104 = arith.constant 0 : index
    %c0_105 = arith.constant 0 : index
    %c0_106 = arith.constant 0 : index
    %101 = vector.load %arg16[%c0_104, %c0_105, %c0_106] : memref<4x8x4xf32, #tpu.memory_space<vmem>>, vector<4x8x4xf32>
    %102 = vector.shape_cast %82 : vector<8x4xf32> to vector<1x8x4xf32>
    %c2_107 = arith.constant 2 : index
    %c0_108 = arith.constant 0 : index
    %c0_109 = arith.constant 0 : index
    %c0_110 = arith.constant 0 : index
    %103 = vector.load %arg13[%c2_107, %c0_108, %c0_109, %c0_110] : memref<4x4x8x4xf32, #tpu.memory_space<vmem>>, vector<1x4x8x4xf32>
    %104 = vector.shape_cast %103 : vector<1x4x8x4xf32> to vector<4x8x4xf32>
    %105 = vector.broadcast %102 : vector<1x8x4xf32> to vector<4x8x4xf32>
    %106 = arith.mulf %105, %104 : vector<4x8x4xf32>
    %107 = arith.addf %91, %106 : vector<4x8x4xf32>
    %108 = arith.addf %101, %107 : vector<4x8x4xf32>
    %c0_111 = arith.constant 0 : index
    %c0_112 = arith.constant 0 : index
    %c0_113 = arith.constant 0 : index
    %109 = vector.load %arg16[%c0_111, %c0_112, %c0_113] : memref<4x8x4xf32, #tpu.memory_space<vmem>>, vector<4x8x4xf32>
    tpu.vector_store %arg16[%c0_111, %c0_112, %c0_113], %108 {strides = array<i32>} : memref<4x8x4xf32, #tpu.memory_space<vmem>>, vector<4x8x4xf32>,
    %c0_114 = arith.constant 0 : index
    %c3 = arith.constant 3 : index
    %c0_115 = arith.constant 0 : index
    %c0_116 = arith.constant 0 : index
    %110 = vector.load %arg2[%c0_114, %c3, %c0_115, %c0_116] : memref<1x4x16x16xf32, #tpu.memory_space<vmem>>, vector<1x1x16x16xf32>
    %111 = vector.shape_cast %110 : vector<1x1x16x16xf32> to vector<16x16xf32>
    %cst_117 = arith.constant dense<0.000000e+00> : vector<8x16xf32>
    %112 = tpu.matmul %4, %111, %cst_117 {dimension_numbers = #tpu.dot_dimension_numbers<[1], [0], [0], [1], [0, 0, 1, 1], [], []>} : vector<8x16xf32>, vector<16x16xf32>, vector<8x16xf32> -> vector<8x16xf32>
    %cst_118 = arith.constant dense<0.000000e+00> : vector<8x16xf32>
    %113 = tpu.matmul %5, %111, %cst_118 {dimension_numbers = #tpu.dot_dimension_numbers<[1], [0], [0], [1], [0, 0, 1, 1], [], []>} : vector<8x16xf32>, vector<16x16xf32>, vector<8x16xf32> -> vector<8x16xf32>
    %cst_119 = arith.constant dense<0.000000e+00> : vector<8x4xf32>
    %114 = tpu.matmul %112, %6, %cst_119 {dimension_numbers = #tpu.dot_dimension_numbers<[1], [0], [0], [1], [0, 0, 1, 1], [], []>} : vector<8x16xf32>, vector<16x4xf32>, vector<8x4xf32> -> vector<8x4xf32>
    %cst_120 = arith.constant dense<0.000000e+00> : vector<8x4xf32>
    %115 = tpu.matmul %113, %7, %cst_120 {dimension_numbers = #tpu.dot_dimension_numbers<[1], [0], [0], [1], [0, 0, 1, 1], [], []>} : vector<8x16xf32>, vector<16x4xf32>, vector<8x4xf32> -> vector<8x4xf32>
    %116 = arith.subf %114, %115 : vector<8x4xf32>
    %cst_121 = arith.constant dense<0.000000e+00> : vector<8x4xf32>
    %117 = tpu.matmul %112, %7, %cst_121 {dimension_numbers = #tpu.dot_dimension_numbers<[1], [0], [0], [1], [0, 0, 1, 1], [], []>} : vector<8x16xf32>, vector<16x4xf32>, vector<8x4xf32> -> vector<8x4xf32>
    %cst_122 = arith.constant dense<0.000000e+00> : vector<8x4xf32>
    %118 = tpu.matmul %113, %6, %cst_122 {dimension_numbers = #tpu.dot_dimension_numbers<[1], [0], [0], [1], [0, 0, 1, 1], [], []>} : vector<8x16xf32>, vector<16x4xf32>, vector<8x4xf32> -> vector<8x4xf32>
    %119 = arith.addf %117, %118 : vector<8x4xf32>
    %c3_123 = arith.constant 3 : index
    %c0_124 = arith.constant 0 : index
    %c0_125 = arith.constant 0 : index
    %c0_126 = arith.constant 0 : index
    %120 = vector.load %arg11[%c3_123, %c0_124, %c0_125, %c0_126] : memref<4x4x8x4xf32, #tpu.memory_space<vmem>>, vector<1x4x8x4xf32>
    %121 = vector.shape_cast %120 : vector<1x4x8x4xf32> to vector<4x8x4xf32>
    %122 = arith.addf %116, %119 : vector<8x4xf32>
    %123 = vector.shape_cast %122 : vector<8x4xf32> to vector<1x8x4xf32>
    %124 = vector.broadcast %123 : vector<1x8x4xf32> to vector<4x8x4xf32>
    %125 = arith.mulf %121, %124 : vector<4x8x4xf32>
    %c0_127 = arith.constant 0 : index
    %c0_128 = arith.constant 0 : index
    %c0_129 = arith.constant 0 : index
    %126 = vector.load %arg15[%c0_127, %c0_128, %c0_129] : memref<4x8x4xf32, #tpu.memory_space<vmem>>, vector<4x8x4xf32>
    %127 = vector.shape_cast %119 : vector<8x4xf32> to vector<1x8x4xf32>
    %c3_130 = arith.constant 3 : index
    %c0_131 = arith.constant 0 : index
    %c0_132 = arith.constant 0 : index
    %c0_133 = arith.constant 0 : index
    %128 = vector.load %arg12[%c3_130, %c0_131, %c0_132, %c0_133] : memref<4x4x8x4xf32, #tpu.memory_space<vmem>>, vector<1x4x8x4xf32>
    %129 = vector.shape_cast %128 : vector<1x4x8x4xf32> to vector<4x8x4xf32>
    %130 = vector.broadcast %127 : vector<1x8x4xf32> to vector<4x8x4xf32>
    %131 = arith.mulf %130, %129 : vector<4x8x4xf32>
    %132 = arith.subf %125, %131 : vector<4x8x4xf32>
    %133 = arith.addf %126, %132 : vector<4x8x4xf32>
    %c0_134 = arith.constant 0 : index
    %c0_135 = arith.constant 0 : index
    %c0_136 = arith.constant 0 : index
    %134 = vector.load %arg15[%c0_134, %c0_135, %c0_136] : memref<4x8x4xf32, #tpu.memory_space<vmem>>, vector<4x8x4xf32>
    tpu.vector_store %arg15[%c0_134, %c0_135, %c0_136], %133 {strides = array<i32>} : memref<4x8x4xf32, #tpu.memory_space<vmem>>, vector<4x8x4xf32>,
    %c0_137 = arith.constant 0 : index
    %c0_138 = arith.constant 0 : index
    %c0_139 = arith.constant 0 : index
    %135 = vector.load %arg16[%c0_137, %c0_138, %c0_139] : memref<4x8x4xf32, #tpu.memory_space<vmem>>, vector<4x8x4xf32>
    %136 = vector.shape_cast %116 : vector<8x4xf32> to vector<1x8x4xf32>
    %c3_140 = arith.constant 3 : index
    %c0_141 = arith.constant 0 : index
    %c0_142 = arith.constant 0 : index
    %c0_143 = arith.constant 0 : index
    %137 = vector.load %arg13[%c3_140, %c0_141, %c0_142, %c0_143] : memref<4x4x8x4xf32, #tpu.memory_space<vmem>>, vector<1x4x8x4xf32>
    %138 = vector.shape_cast %137 : vector<1x4x8x4xf32> to vector<4x8x4xf32>
    %139 = vector.broadcast %136 : vector<1x8x4xf32> to vector<4x8x4xf32>
    %140 = arith.mulf %139, %138 : vector<4x8x4xf32>
    %141 = arith.addf %125, %140 : vector<4x8x4xf32>
    %142 = arith.addf %135, %141 : vector<4x8x4xf32>
    %c0_144 = arith.constant 0 : index
    %c0_145 = arith.constant 0 : index
    %c0_146 = arith.constant 0 : index
    %143 = vector.load %arg16[%c0_144, %c0_145, %c0_146] : memref<4x8x4xf32, #tpu.memory_space<vmem>>, vector<4x8x4xf32>
    tpu.vector_store %arg16[%c0_144, %c0_145, %c0_146], %142 {strides = array<i32>} : memref<4x8x4xf32, #tpu.memory_space<vmem>>, vector<4x8x4xf32>,
    %c0_147 = arith.constant 0 : index
    %c0_148 = arith.constant 0 : index
    %144 = vector.load %arg7[%c0_147, %c0_148] : memref<16x8xf32, #tpu.memory_space<vmem>>, vector<16x8xf32>
    %c0_149 = arith.constant 0 : index
    %c0_150 = arith.constant 0 : index
    %145 = vector.load %arg8[%c0_149, %c0_150] : memref<16x8xf32, #tpu.memory_space<vmem>>, vector<16x8xf32>
    %c0_151 = arith.constant 0 : index
    %c0_152 = arith.constant 0 : index
    %146 = vector.load %arg9[%c0_151, %c0_152] : memref<4x16xf32, #tpu.memory_space<vmem>>, vector<4x16xf32>
    %c0_153 = arith.constant 0 : index
    %c0_154 = arith.constant 0 : index
    %147 = vector.load %arg10[%c0_153, %c0_154] : memref<4x16xf32, #tpu.memory_space<vmem>>, vector<4x16xf32>
    %c0_155 = arith.constant 0 : index
    %c0_156 = arith.constant 0 : index
    %c0_157 = arith.constant 0 : index
    %148 = vector.load %arg15[%c0_155, %c0_156, %c0_157] : memref<4x8x4xf32, #tpu.memory_space<vmem>>, vector<1x8x4xf32>
    %149 = vector.shape_cast %148 : vector<1x8x4xf32> to vector<8x4xf32>
    %c0_158 = arith.constant 0 : index
    %c0_159 = arith.constant 0 : index
    %c0_160 = arith.constant 0 : index
    %150 = vector.load %arg16[%c0_158, %c0_159, %c0_160] : memref<4x8x4xf32, #tpu.memory_space<vmem>>, vector<1x8x4xf32>
    %151 = vector.shape_cast %150 : vector<1x8x4xf32> to vector<8x4xf32>
    %cst_161 = arith.constant dense<0.000000e+00> : vector<16x4xf32>
    %152 = tpu.matmul %144, %149, %cst_161 {dimension_numbers = #tpu.dot_dimension_numbers<[1], [0], [0], [1], [0, 0, 1, 1], [], []>} : vector<16x8xf32>, vector<8x4xf32>, vector<16x4xf32> -> vector<16x4xf32>
    %cst_162 = arith.constant dense<0.000000e+00> : vector<16x4xf32>
    %153 = tpu.matmul %145, %151, %cst_162 {dimension_numbers = #tpu.dot_dimension_numbers<[1], [0], [0], [1], [0, 0, 1, 1], [], []>} : vector<16x8xf32>, vector<8x4xf32>, vector<16x4xf32> -> vector<16x4xf32>
    %154 = arith.subf %152, %153 : vector<16x4xf32>
    %cst_163 = arith.constant dense<0.000000e+00> : vector<16x4xf32>
    %155 = tpu.matmul %144, %151, %cst_163 {dimension_numbers = #tpu.dot_dimension_numbers<[1], [0], [0], [1], [0, 0, 1, 1], [], []>} : vector<16x8xf32>, vector<8x4xf32>, vector<16x4xf32> -> vector<16x4xf32>
    %cst_164 = arith.constant dense<0.000000e+00> : vector<16x4xf32>
    %156 = tpu.matmul %145, %149, %cst_164 {dimension_numbers = #tpu.dot_dimension_numbers<[1], [0], [0], [1], [0, 0, 1, 1], [], []>} : vector<16x8xf32>, vector<8x4xf32>, vector<16x4xf32> -> vector<16x4xf32>
    %157 = arith.addf %155, %156 : vector<16x4xf32>
    %cst_165 = arith.constant dense<0.000000e+00> : vector<16x16xf32>
    %158 = tpu.matmul %154, %146, %cst_165 {dimension_numbers = #tpu.dot_dimension_numbers<[1], [0], [0], [1], [0, 0, 1, 1], [], []>} : vector<16x4xf32>, vector<4x16xf32>, vector<16x16xf32> -> vector<16x16xf32>
    %cst_166 = arith.constant dense<0.000000e+00> : vector<16x16xf32>
    %159 = tpu.matmul %157, %147, %cst_166 {dimension_numbers = #tpu.dot_dimension_numbers<[1], [0], [0], [1], [0, 0, 1, 1], [], []>} : vector<16x4xf32>, vector<4x16xf32>, vector<16x16xf32> -> vector<16x16xf32>
    %160 = arith.subf %158, %159 : vector<16x16xf32>
    %c0_167 = arith.constant 0 : index
    %c0_168 = arith.constant 0 : index
    %c0_169 = arith.constant 0 : index
    %c0_170 = arith.constant 0 : index
    %161 = vector.load %arg14[%c0_167, %c0_168, %c0_169, %c0_170] : memref<1x4x16x16xf32, #tpu.memory_space<vmem>>, vector<1x1x16x16xf32>
    %162 = vector.shape_cast %161 : vector<1x1x16x16xf32> to vector<16x16xf32>
    %163 = vector.shape_cast %160 : vector<16x16xf32> to vector<1x1x16x16xf32>
    tpu.vector_store %arg14[%c0_167, %c0_168, %c0_169, %c0_170], %163 {strides = array<i32>} : memref<1x4x16x16xf32, #tpu.memory_space<vmem>>, vector<1x1x16x16xf32>,
    %c1_171 = arith.constant 1 : index
    %c0_172 = arith.constant 0 : index
    %c0_173 = arith.constant 0 : index
    %164 = vector.load %arg15[%c1_171, %c0_172, %c0_173] : memref<4x8x4xf32, #tpu.memory_space<vmem>>, vector<1x8x4xf32>
    %165 = vector.shape_cast %164 : vector<1x8x4xf32> to vector<8x4xf32>
    %c1_174 = arith.constant 1 : index
    %c0_175 = arith.constant 0 : index
    %c0_176 = arith.constant 0 : index
    %166 = vector.load %arg16[%c1_174, %c0_175, %c0_176] : memref<4x8x4xf32, #tpu.memory_space<vmem>>, vector<1x8x4xf32>
    %167 = vector.shape_cast %166 : vector<1x8x4xf32> to vector<8x4xf32>
    %cst_177 = arith.constant dense<0.000000e+00> : vector<16x4xf32>
    %168 = tpu.matmul %144, %165, %cst_177 {dimension_numbers = #tpu.dot_dimension_numbers<[1], [0], [0], [1], [0, 0, 1, 1], [], []>} : vector<16x8xf32>, vector<8x4xf32>, vector<16x4xf32> -> vector<16x4xf32>
    %cst_178 = arith.constant dense<0.000000e+00> : vector<16x4xf32>
    %169 = tpu.matmul %145, %167, %cst_178 {dimension_numbers = #tpu.dot_dimension_numbers<[1], [0], [0], [1], [0, 0, 1, 1], [], []>} : vector<16x8xf32>, vector<8x4xf32>, vector<16x4xf32> -> vector<16x4xf32>
    %170 = arith.subf %168, %169 : vector<16x4xf32>
    %cst_179 = arith.constant dense<0.000000e+00> : vector<16x4xf32>
    %171 = tpu.matmul %144, %167, %cst_179 {dimension_numbers = #tpu.dot_dimension_numbers<[1], [0], [0], [1], [0, 0, 1, 1], [], []>} : vector<16x8xf32>, vector<8x4xf32>, vector<16x4xf32> -> vector<16x4xf32>
    %cst_180 = arith.constant dense<0.000000e+00> : vector<16x4xf32>
    %172 = tpu.matmul %145, %165, %cst_180 {dimension_numbers = #tpu.dot_dimension_numbers<[1], [0], [0], [1], [0, 0, 1, 1], [], []>} : vector<16x8xf32>, vector<8x4xf32>, vector<16x4xf32> -> vector<16x4xf32>
    %173 = arith.addf %171, %172 : vector<16x4xf32>
    %cst_181 = arith.constant dense<0.000000e+00> : vector<16x16xf32>
    %174 = tpu.matmul %170, %146, %cst_181 {dimension_numbers = #tpu.dot_dimension_numbers<[1], [0], [0], [1], [0, 0, 1, 1], [], []>} : vector<16x4xf32>, vector<4x16xf32>, vector<16x16xf32> -> vector<16x16xf32>
    %cst_182 = arith.constant dense<0.000000e+00> : vector<16x16xf32>
    %175 = tpu.matmul %173, %147, %cst_182 {dimension_numbers = #tpu.dot_dimension_numbers<[1], [0], [0], [1], [0, 0, 1, 1], [], []>} : vector<16x4xf32>, vector<4x16xf32>, vector<16x16xf32> -> vector<16x16xf32>
    %176 = arith.subf %174, %175 : vector<16x16xf32>
    %c0_183 = arith.constant 0 : index
    %c1_184 = arith.constant 1 : index
    %c0_185 = arith.constant 0 : index
    %c0_186 = arith.constant 0 : index
    %177 = vector.load %arg14[%c0_183, %c1_184, %c0_185, %c0_186] : memref<1x4x16x16xf32, #tpu.memory_space<vmem>>, vector<1x1x16x16xf32>
    %178 = vector.shape_cast %177 : vector<1x1x16x16xf32> to vector<16x16xf32>
    %179 = vector.shape_cast %176 : vector<16x16xf32> to vector<1x1x16x16xf32>
    tpu.vector_store %arg14[%c0_183, %c1_184, %c0_185, %c0_186], %179 {strides = array<i32>} : memref<1x4x16x16xf32, #tpu.memory_space<vmem>>, vector<1x1x16x16xf32>,
    %c2_187 = arith.constant 2 : index
    %c0_188 = arith.constant 0 : index
    %c0_189 = arith.constant 0 : index
    %180 = vector.load %arg15[%c2_187, %c0_188, %c0_189] : memref<4x8x4xf32, #tpu.memory_space<vmem>>, vector<1x8x4xf32>
    %181 = vector.shape_cast %180 : vector<1x8x4xf32> to vector<8x4xf32>
    %c2_190 = arith.constant 2 : index
    %c0_191 = arith.constant 0 : index
    %c0_192 = arith.constant 0 : index
    %182 = vector.load %arg16[%c2_190, %c0_191, %c0_192] : memref<4x8x4xf32, #tpu.memory_space<vmem>>, vector<1x8x4xf32>
    %183 = vector.shape_cast %182 : vector<1x8x4xf32> to vector<8x4xf32>
    %cst_193 = arith.constant dense<0.000000e+00> : vector<16x4xf32>
    %184 = tpu.matmul %144, %181, %cst_193 {dimension_numbers = #tpu.dot_dimension_numbers<[1], [0], [0], [1], [0, 0, 1, 1], [], []>} : vector<16x8xf32>, vector<8x4xf32>, vector<16x4xf32> -> vector<16x4xf32>
    %cst_194 = arith.constant dense<0.000000e+00> : vector<16x4xf32>
    %185 = tpu.matmul %145, %183, %cst_194 {dimension_numbers = #tpu.dot_dimension_numbers<[1], [0], [0], [1], [0, 0, 1, 1], [], []>} : vector<16x8xf32>, vector<8x4xf32>, vector<16x4xf32> -> vector<16x4xf32>
    %186 = arith.subf %184, %185 : vector<16x4xf32>
    %cst_195 = arith.constant dense<0.000000e+00> : vector<16x4xf32>
    %187 = tpu.matmul %144, %183, %cst_195 {dimension_numbers = #tpu.dot_dimension_numbers<[1], [0], [0], [1], [0, 0, 1, 1], [], []>} : vector<16x8xf32>, vector<8x4xf32>, vector<16x4xf32> -> vector<16x4xf32>
    %cst_196 = arith.constant dense<0.000000e+00> : vector<16x4xf32>
    %188 = tpu.matmul %145, %181, %cst_196 {dimension_numbers = #tpu.dot_dimension_numbers<[1], [0], [0], [1], [0, 0, 1, 1], [], []>} : vector<16x8xf32>, vector<8x4xf32>, vector<16x4xf32> -> vector<16x4xf32>
    %189 = arith.addf %187, %188 : vector<16x4xf32>
    %cst_197 = arith.constant dense<0.000000e+00> : vector<16x16xf32>
    %190 = tpu.matmul %186, %146, %cst_197 {dimension_numbers = #tpu.dot_dimension_numbers<[1], [0], [0], [1], [0, 0, 1, 1], [], []>} : vector<16x4xf32>, vector<4x16xf32>, vector<16x16xf32> -> vector<16x16xf32>
    %cst_198 = arith.constant dense<0.000000e+00> : vector<16x16xf32>
    %191 = tpu.matmul %189, %147, %cst_198 {dimension_numbers = #tpu.dot_dimension_numbers<[1], [0], [0], [1], [0, 0, 1, 1], [], []>} : vector<16x4xf32>, vector<4x16xf32>, vector<16x16xf32> -> vector<16x16xf32>
    %192 = arith.subf %190, %191 : vector<16x16xf32>
    %c0_199 = arith.constant 0 : index
    %c2_200 = arith.constant 2 : index
    %c0_201 = arith.constant 0 : index
    %c0_202 = arith.constant 0 : index
    %193 = vector.load %arg14[%c0_199, %c2_200, %c0_201, %c0_202] : memref<1x4x16x16xf32, #tpu.memory_space<vmem>>, vector<1x1x16x16xf32>
    %194 = vector.shape_cast %193 : vector<1x1x16x16xf32> to vector<16x16xf32>
    %195 = vector.shape_cast %192 : vector<16x16xf32> to vector<1x1x16x16xf32>
    tpu.vector_store %arg14[%c0_199, %c2_200, %c0_201, %c0_202], %195 {strides = array<i32>} : memref<1x4x16x16xf32, #tpu.memory_space<vmem>>, vector<1x1x16x16xf32>,
    %c3_203 = arith.constant 3 : index
    %c0_204 = arith.constant 0 : index
    %c0_205 = arith.constant 0 : index
    %196 = vector.load %arg15[%c3_203, %c0_204, %c0_205] : memref<4x8x4xf32, #tpu.memory_space<vmem>>, vector<1x8x4xf32>
    %197 = vector.shape_cast %196 : vector<1x8x4xf32> to vector<8x4xf32>
    %c3_206 = arith.constant 3 : index
    %c0_207 = arith.constant 0 : index
    %c0_208 = arith.constant 0 : index
    %198 = vector.load %arg16[%c3_206, %c0_207, %c0_208] : memref<4x8x4xf32, #tpu.memory_space<vmem>>, vector<1x8x4xf32>
    %199 = vector.shape_cast %198 : vector<1x8x4xf32> to vector<8x4xf32>
    %cst_209 = arith.constant dense<0.000000e+00> : vector<16x4xf32>
    %200 = tpu.matmul %144, %197, %cst_209 {dimension_numbers = #tpu.dot_dimension_numbers<[1], [0], [0], [1], [0, 0, 1, 1], [], []>} : vector<16x8xf32>, vector<8x4xf32>, vector<16x4xf32> -> vector<16x4xf32>
    %cst_210 = arith.constant dense<0.000000e+00> : vector<16x4xf32>
    %201 = tpu.matmul %145, %199, %cst_210 {dimension_numbers = #tpu.dot_dimension_numbers<[1], [0], [0], [1], [0, 0, 1, 1], [], []>} : vector<16x8xf32>, vector<8x4xf32>, vector<16x4xf32> -> vector<16x4xf32>
    %202 = arith.subf %200, %201 : vector<16x4xf32>
    %cst_211 = arith.constant dense<0.000000e+00> : vector<16x4xf32>
    %203 = tpu.matmul %144, %199, %cst_211 {dimension_numbers = #tpu.dot_dimension_numbers<[1], [0], [0], [1], [0, 0, 1, 1], [], []>} : vector<16x8xf32>, vector<8x4xf32>, vector<16x4xf32> -> vector<16x4xf32>
    %cst_212 = arith.constant dense<0.000000e+00> : vector<16x4xf32>
    %204 = tpu.matmul %145, %197, %cst_212 {dimension_numbers = #tpu.dot_dimension_numbers<[1], [0], [0], [1], [0, 0, 1, 1], [], []>} : vector<16x8xf32>, vector<8x4xf32>, vector<16x4xf32> -> vector<16x4xf32>
    %205 = arith.addf %203, %204 : vector<16x4xf32>
    %cst_213 = arith.constant dense<0.000000e+00> : vector<16x16xf32>
    %206 = tpu.matmul %202, %146, %cst_213 {dimension_numbers = #tpu.dot_dimension_numbers<[1], [0], [0], [1], [0, 0, 1, 1], [], []>} : vector<16x4xf32>, vector<4x16xf32>, vector<16x16xf32> -> vector<16x16xf32>
    %cst_214 = arith.constant dense<0.000000e+00> : vector<16x16xf32>
    %207 = tpu.matmul %205, %147, %cst_214 {dimension_numbers = #tpu.dot_dimension_numbers<[1], [0], [0], [1], [0, 0, 1, 1], [], []>} : vector<16x4xf32>, vector<4x16xf32>, vector<16x16xf32> -> vector<16x16xf32>
    %208 = arith.subf %206, %207 : vector<16x16xf32>
    %c0_215 = arith.constant 0 : index
    %c3_216 = arith.constant 3 : index
    %c0_217 = arith.constant 0 : index
    %c0_218 = arith.constant 0 : index
    %209 = vector.load %arg14[%c0_215, %c3_216, %c0_217, %c0_218] : memref<1x4x16x16xf32, #tpu.memory_space<vmem>>, vector<1x1x16x16xf32>
    %210 = vector.shape_cast %209 : vector<1x1x16x16xf32> to vector<16x16xf32>
    %211 = vector.shape_cast %208 : vector<16x16xf32> to vector<1x1x16x16xf32>
    tpu.vector_store %arg14[%c0_215, %c3_216, %c0_217, %c0_218], %211 {strides = array<i32>} : memref<1x4x16x16xf32, #tpu.memory_space<vmem>>, vector<1x1x16x16xf32>,
    return
  }
  func.func @transform_0(%arg0: i32, %arg1: i32) -> (i32, i32, i32, i32) {
    %c0_i32 = arith.constant 0 : i32
    %c0_i32_0 = arith.constant 0 : i32
    %c0_i32_1 = arith.constant 0 : i32
    %c0_i32_2 = arith.constant 0 : i32
    return %arg0, %c0_i32, %c0_i32_0, %c0_i32_1 : i32, i32, i32, i32
  }
  func.func @transform_1(%arg0: i32, %arg1: i32) -> (i32, i32) {
    %c0_i32 = arith.constant 0 : i32
    %c0_i32_0 = arith.constant 0 : i32
    %c0_i32_1 = arith.constant 0 : i32
    return %c0_i32, %c0_i32_0 : i32, i32
  }
  func.func @transform_2(%arg0: i32, %arg1: i32) -> (i32, i32) {
    %c0_i32 = arith.constant 0 : i32
    %c0_i32_0 = arith.constant 0 : i32
    %c0_i32_1 = arith.constant 0 : i32
    return %c0_i32, %c0_i32_0 : i32, i32
  }
  func.func @transform_3(%arg0: i32, %arg1: i32) -> (i32, i32) {
    %c0_i32 = arith.constant 0 : i32
    %c0_i32_0 = arith.constant 0 : i32
    %c0_i32_1 = arith.constant 0 : i32
    return %c0_i32, %c0_i32_0 : i32, i32
  }
  func.func @transform_4(%arg0: i32, %arg1: i32) -> (i32, i32) {
    %c0_i32 = arith.constant 0 : i32
    %c0_i32_0 = arith.constant 0 : i32
    %c0_i32_1 = arith.constant 0 : i32
    return %c0_i32, %c0_i32_0 : i32, i32
  }
  func.func @transform_5(%arg0: i32, %arg1: i32) -> (i32, i32) {
    %c0_i32 = arith.constant 0 : i32
    %c0_i32_0 = arith.constant 0 : i32
    %c0_i32_1 = arith.constant 0 : i32
    return %c0_i32, %c0_i32_0 : i32, i32
  }
  func.func @transform_6(%arg0: i32, %arg1: i32) -> (i32, i32) {
    %c0_i32 = arith.constant 0 : i32
    %c0_i32_0 = arith.constant 0 : i32
    %c0_i32_1 = arith.constant 0 : i32
    return %c0_i32, %c0_i32_0 : i32, i32
  }
  func.func @transform_7(%arg0: i32, %arg1: i32) -> (i32, i32) {
    %c0_i32 = arith.constant 0 : i32
    %c0_i32_0 = arith.constant 0 : i32
    %c0_i32_1 = arith.constant 0 : i32
    return %c0_i32, %c0_i32_0 : i32, i32
  }
  func.func @transform_8(%arg0: i32, %arg1: i32) -> (i32, i32) {
    %c0_i32 = arith.constant 0 : i32
    %c0_i32_0 = arith.constant 0 : i32
    %c0_i32_1 = arith.constant 0 : i32
    return %c0_i32, %c0_i32_0 : i32, i32
  }
  func.func @transform_9(%arg0: i32, %arg1: i32) -> (i32, i32, i32, i32) {
    %c0_i32 = arith.constant 0 : i32
    %c0_i32_0 = arith.constant 0 : i32
    %c0_i32_1 = arith.constant 0 : i32
    %c0_i32_2 = arith.constant 0 : i32
    return %c0_i32, %arg1, %c0_i32_0, %c0_i32_1 : i32, i32, i32, i32
  }
  func.func @transform_10(%arg0: i32, %arg1: i32) -> (i32, i32, i32, i32) {
    %c0_i32 = arith.constant 0 : i32
    %c0_i32_0 = arith.constant 0 : i32
    %c0_i32_1 = arith.constant 0 : i32
    %c0_i32_2 = arith.constant 0 : i32
    return %c0_i32, %arg1, %c0_i32_0, %c0_i32_1 : i32, i32, i32, i32
  }
  func.func @transform_11(%arg0: i32, %arg1: i32) -> (i32, i32, i32, i32) {
    %c0_i32 = arith.constant 0 : i32
    %c0_i32_0 = arith.constant 0 : i32
    %c0_i32_1 = arith.constant 0 : i32
    %c0_i32_2 = arith.constant 0 : i32
    return %c0_i32, %arg1, %c0_i32_0, %c0_i32_1 : i32, i32, i32, i32
  }
  func.func @transform_12(%arg0: i32, %arg1: i32) -> (i32, i32, i32, i32) {
    %c0_i32 = arith.constant 0 : i32
    %c0_i32_0 = arith.constant 0 : i32
    %c0_i32_1 = arith.constant 0 : i32
    return %arg0, %arg1, %c0_i32, %c0_i32_0 : i32, i32, i32, i32
  }
}

module attributes {stable_mosaic.version = 11 : i64} {
  func.func @_res_gelu_kernel(%arg0: i32, %arg1: i32, %arg2: memref<1x4x256xf32, #tpu.memory_space<vmem>>, %arg3: memref<1x4x256xf32, #tpu.memory_space<vmem>>, %arg4: memref<4x4xf32, #tpu.memory_space<vmem>>, %arg5: memref<4x1xf32, #tpu.memory_space<vmem>>, %arg6: memref<1x4x256xf32, #tpu.memory_space<vmem>>) attributes {dimension_semantics = [#tpu.dimension_semantics<parallel>, #tpu.dimension_semantics<parallel>], iteration_bounds = array<i64: 2, 1>, scalar_prefetch = 0 : i64, scratch_operands = 0 : i64, tpu.core_type = #tpu.core_type<tc>, window_params = [{transform_indices = @transform_0, window_bounds = array<i64: 1, 4, 256>}, {transform_indices = @transform_1, window_bounds = array<i64: 1, 4, 256>}, {pipeline_mode = #tpu.pipeline_mode<synchronous>, transform_indices = @transform_2, window_bounds = array<i64: 4, 4>}, {pipeline_mode = #tpu.pipeline_mode<synchronous>, transform_indices = @transform_3, window_bounds = array<i64: 4, 1>}, {transform_indices = @transform_4, window_bounds = array<i64: 1, 4, 256>}]} {
    %c0 = arith.constant 0 : index
    %c0_0 = arith.constant 0 : index
    %0 = vector.load %arg4[%c0, %c0_0] : memref<4x4xf32, #tpu.memory_space<vmem>>, vector<4x4xf32>
    %c0_1 = arith.constant 0 : index
    %c0_2 = arith.constant 0 : index
    %c0_3 = arith.constant 0 : index
    %1 = vector.load %arg2[%c0_1, %c0_2, %c0_3] : memref<1x4x256xf32, #tpu.memory_space<vmem>>, vector<1x4x256xf32>
    %2 = vector.shape_cast %1 : vector<1x4x256xf32> to vector<4x256xf32>
    %cst = arith.constant dense<0.000000e+00> : vector<4x256xf32>
    %3 = tpu.matmul %0, %2, %cst {dimension_numbers = #tpu.dot_dimension_numbers<[1], [0], [0], [1], [0, 0, 1, 1], [], []>} : vector<4x4xf32>, vector<4x256xf32>, vector<4x256xf32> -> vector<4x256xf32>
    %c0_4 = arith.constant 0 : index
    %c0_5 = arith.constant 0 : index
    %4 = vector.load %arg5[%c0_4, %c0_5] : memref<4x1xf32, #tpu.memory_space<vmem>>, vector<4x1xf32>
    %5 = vector.broadcast %4 : vector<4x1xf32> to vector<4x256xf32>
    %6 = arith.addf %3, %5 : vector<4x256xf32>
    %c0_6 = arith.constant 0 : index
    %c0_7 = arith.constant 0 : index
    %c0_8 = arith.constant 0 : index
    %7 = vector.load %arg3[%c0_6, %c0_7, %c0_8] : memref<1x4x256xf32, #tpu.memory_space<vmem>>, vector<1x4x256xf32>
    %8 = vector.shape_cast %7 : vector<1x4x256xf32> to vector<4x256xf32>
    %9 = arith.addf %8, %6 : vector<4x256xf32>
    %cst_9 = arith.constant 5.000000e-01 : f32
    %10 = vector.broadcast %cst_9 : f32 to vector<4x256xf32>
    %11 = arith.mulf %10, %9 : vector<4x256xf32>
    %cst_10 = arith.constant 0.707106769 : f32
    %12 = vector.broadcast %cst_10 : f32 to vector<4x256xf32>
    %13 = arith.mulf %9, %12 : vector<4x256xf32>
    %14 = math.erf %13 : vector<4x256xf32>
    %cst_11 = arith.constant 1.000000e+00 : f32
    %15 = vector.broadcast %cst_11 : f32 to vector<4x256xf32>
    %16 = arith.addf %15, %14 : vector<4x256xf32>
    %17 = arith.mulf %11, %16 : vector<4x256xf32>
    %c0_12 = arith.constant 0 : index
    %c0_13 = arith.constant 0 : index
    %c0_14 = arith.constant 0 : index
    %18 = vector.load %arg6[%c0_12, %c0_13, %c0_14] : memref<1x4x256xf32, #tpu.memory_space<vmem>>, vector<1x4x256xf32>
    %19 = vector.shape_cast %18 : vector<1x4x256xf32> to vector<4x256xf32>
    %20 = vector.shape_cast %17 : vector<4x256xf32> to vector<1x4x256xf32>
    tpu.vector_store %arg6[%c0_12, %c0_13, %c0_14], %20 {strides = array<i32>} : memref<1x4x256xf32, #tpu.memory_space<vmem>>, vector<1x4x256xf32>,
    return
  }
  func.func @transform_0(%arg0: i32, %arg1: i32) -> (i32, i32, i32) {
    %c0_i32 = arith.constant 0 : i32
    %c0_i32_0 = arith.constant 0 : i32
    return %arg0, %c0_i32, %arg1 : i32, i32, i32
  }
  func.func @transform_1(%arg0: i32, %arg1: i32) -> (i32, i32, i32) {
    %c0_i32 = arith.constant 0 : i32
    %c0_i32_0 = arith.constant 0 : i32
    return %arg0, %c0_i32, %arg1 : i32, i32, i32
  }
  func.func @transform_2(%arg0: i32, %arg1: i32) -> (i32, i32) {
    %c0_i32 = arith.constant 0 : i32
    %c0_i32_0 = arith.constant 0 : i32
    %c0_i32_1 = arith.constant 0 : i32
    return %c0_i32, %c0_i32_0 : i32, i32
  }
  func.func @transform_3(%arg0: i32, %arg1: i32) -> (i32, i32) {
    %c0_i32 = arith.constant 0 : i32
    %c0_i32_0 = arith.constant 0 : i32
    %c0_i32_1 = arith.constant 0 : i32
    return %c0_i32, %c0_i32_0 : i32, i32
  }
  func.func @transform_4(%arg0: i32, %arg1: i32) -> (i32, i32, i32) {
    %c0_i32 = arith.constant 0 : i32
    %c0_i32_0 = arith.constant 0 : i32
    return %arg0, %c0_i32, %arg1 : i32, i32, i32
  }
}

</mosaic_0001>

<bundles_post_ra>
// kernel: spectral_conv2d_forward.3
= control target key start
LH: loop header
LB: loop body
LE: loop exit
PB: predicated region body
PF: predicated region fallthrough
CT: control target
= control target key end

     0   :  { %s580_s15 = smov 0   ;;  %s582_s16 = smov 0   ;;  %s622_s0 = inlined_call_operand.vmem [shape: f32[2,4,256], index: 0, kind: input, shape index: {}]   ;;  %s623_s1 = inlined_call_operand.vmem [shape: f32[2,4,256], index: 1, kind: input, shape index: {}]   ;;  %s624_s2 = inlined_call_operand.vmem [shape: f32[4,4], index: 2, kind: input, shape index: {}]   ;;  %s625_s3 = inlined_call_operand.vmem [shape: f32[4,1], index: 3, kind: input, shape index: {}]   ;;  %s626_s4 = inlined_call_operand.vmem [shape: f32[2,4,256], index: 4, kind: output, shape index: {}]  }
   0x1   :  { %s584_s17 = smov 0  }
   0x2 LB: > { %s26_s18 = sadd.s32 1, %s547_s16  ;;  %p484_p0 = scmp.ge.s32.totalorder %s551_s17, 1  ;;  %s551_s17 = sphi %s584_s17, %s14_s17   ;;  %s547_s16 = sphi %s582_s16, %s628_s16   ;;  %s543_s15 = sphi %s580_s15, %s627_s15  }
   0x3   : > { %p28_p1 = scmp.ge.s32.totalorder %s26_s18, 2  ;;  %p200_p2 = scmp.lt.s32.totalorder %s551_s17, 3 }
   0x5   : > { %s630_s18 = smov (%p28_p1, %s26_s18), 0  ;;  %p201_p3 = pnand %p484_p0, %p200_p2 }
   0x6   : > { %p244_p4 = scmp.lt.s32.totalorder (!%p201_p3), %s543_s15, 1  ;;  %v553_v0 = vmov (!%p201_p3), 0.0   ;;  %v275_v1 = vld [vmem:[%s625_s3] sm:$0xf] (!%p201_p3)  ;;  %v554_v2 = vmov (!%p201_p3), 0   ;;  %vm287_vm0 = vcmask (!%p201_p3), 1043456  }
   0x7   : > { %204 = sbr.rel (%p201_p3) target bundleno = 259 (0x103), region = 36  ;;  %356 = vmatprep.mubr.f32.mxu0 (!%p201_p3), %v553_v0  ;;  %525 = vset.pattern.permute.xlu0 (!%p201_p3), %v554_v2  ;;  %v273_v5 = vld [vmem:[%s624_s2] sm:$0xf] (!%p201_p3)  ;;  %vm283_vm1 = vcmask (!%p201_p3), 31744  }
   0x8   : > { %278 = vperm.xlu0 (!%p201_p3), %525, %v275_v1  }
   0xe   : > { %s632_s15 = smov (!%p244_p4, %s543_s15), 1 }
   0xf   : > { %s496_s21 = sshll.u32 %s632_s15, 3 }
  0x10   : > { %s251_s24 = scalar_lea.vmem %s622_s0, %s496_s21  ;;  %s261_s29 = scalar_lea.vmem %s623_s1, %s496_s21 }
  0x11   : > { %v274_v3 = vld [vmem:[%s251_s24] sm:$0xff]  ;;  %s271_s6 = scalar_lea.vmem %s626_s4, %s496_s21 }
  0x12   : > { %v282_v4 = vcombine.high %v274_v3, %v274_v3  ;;  %v363_v11 = vld [vmem:[%s261_s29] sm:$0xff] }
  0x14   : > { %491 = vmatprep.subr.msk.mxu0 %vm287_vm0, %v282_v4 }
  0x15   : > { %492 = vmatpush1.msk.msra.mxu0 %vm287_vm0, %v274_v3 }
  0x16   : > { %493 = vmatmul.mubr.msk.f32.vlgmr.msra.gmra.mrb[0].mxu0 %vm283_vm1, %v273_v5 }
  0x87   : > { %v279_v6 = vpop.permute.xlu0 %278 }
  0xe9   : > { %v358_v7 = vpop.f32.mrb[0].mxu0 }
  0xea   : > { %v359_v8 = vadd.f32 %v358_v7, %v279_v6  ;;  %v360_v9 = vpop.f32.mrb[1].mxu0 }
  0xeb   : > { %v361_v10 = vadd.f32 %v360_v9, %v279_v6 }
  0xed   : > { %v366_v12 = vcombine.low %v359_v8, %v361_v10 }
  0xef   : > { %v368_v13 = vadd.f32 %v366_v12, %v363_v11 }
  0xf1   : > { %v370_v14 = vmul.f32 0.70710677, %v368_v13  ;;  %v369_v16 = vmul.f32 0.5, %v368_v13 }
  0xf3   : > { %527 = verf.f32 %v370_v14 }
  0xfd   : > { %v528_v15 = vpop.eup %527 }
  0xfe   : > { %v372_v17 = vadd.f32 1.0, %v528_v15 }
 0x100   : > { %v373_v18 = vmul.f32 %v372_v17, %v369_v16 }
 0x102   : > { %374 = vst [vmem:[%s271_s6] sm:$0xff] %v373_v18 }
 0x103 PF: > { %s14_s17 = sadd.s32 1, %s551_s17   ;;  %s627_s15 = smov %s547_s16 }
 0x104   : > { %p11_p5 = scmp.ge.s32.totalorder %s14_s17, 4   ;;  %s628_s16 = smov %s630_s18 }
 0x106   :  { %13 = sbr.rel (!%p11_p5) target bundleno = 2 (0x2), region = 69 }

// kernel: spectral_conv2d_forward.2
= control target key start
LH: loop header
LB: loop body
LE: loop exit
PB: predicated region body
PF: predicated region fallthrough
CT: control target
= control target key end

     0   :  { %s5313_s21 = smov 0   ;;  %s5315_s22 = smov 0   ;;  %s5871_s0 = inlined_call_operand.vmem [shape: f32[2,4,16,16], index: 0, kind: input, shape index: {}]   ;;  %s5872_s1 = inlined_call_operand.vmem [shape: f32[8,16], index: 1, kind: input, shape index: {}]   ;;  %s5873_s2 = inlined_call_operand.vmem [shape: f32[8,16], index: 2, kind: input, shape index: {}]   ;;  %s5874_s3 = inlined_call_operand.vmem [shape: f32[16,4], index: 3, kind: input, shape index: {}]   ;;  %s5875_s4 = inlined_call_operand.vmem [shape: f32[16,4], index: 4, kind: input, shape index: {}]   ;;  %s5876_s5 = inlined_call_operand.vmem [shape: f32[16,8], index: 5, kind: input, shape index: {}]   ;;  %s5877_s6 = inlined_call_operand.vmem [shape: f32[16,8], index: 6, kind: input, shape index: {}]   ;;  %s5878_s7 = inlined_call_operand.vmem [shape: f32[4,16], index: 7, kind: input, shape index: {}]   ;;  %s5879_s8 = inlined_call_operand.vmem [shape: f32[4,16], index: 8, kind: input, shape index: {}]   ;;  %s5880_s9 = inlined_call_operand.vmem [shape: f32[4,4,8,4], index: 9, kind: input, shape index: {}]   ;;  %s5881_s10 = inlined_call_operand.vmem [shape: f32[4,4,8,4], index: 10, kind: input, shape index: {}]   ;;  %s5882_s11 = inlined_call_operand.vmem [shape: f32[4,4,8,4], index: 11, kind: input, shape index: {}]   ;;  %s5883_s12 = inlined_call_operand.vmem [shape: f32[2,4,16,16], index: 12, kind: output, shape index: {}]  }
   0x1   :  { %s5317_s23 = smov 0  }
   0x2 LB: > { %s34_s24 = sadd.s32 1, %s5239_s22  ;;  %p4537_p0 = scmp.ge.s32.totalorder %s5243_s23, 1  ;;  %s5243_s23 = sphi %s5317_s23, %s22_s23   ;;  %s5239_s22 = sphi %s5315_s22, %s5885_s22   ;;  %s5235_s21 = sphi %s5313_s21, %s5884_s21  }
   0x3   : > { %p36_p1 = scmp.ge.s32.totalorder %s34_s24, 2  ;;  %p409_p2 = scmp.lt.s32.totalorder %s5243_s23, 3 }
   0x5   : > { %s5887_s24 = smov (%p36_p1, %s34_s24), 0  ;;  %p410_p3 = pnand %p4537_p0, %p409_p2 }
   0x6   : > { %p471_p4 = scmp.lt.s32.totalorder (!%p410_p3), %s5235_s21, 1  ;;  %v5245_v0 = vmov (!%p410_p3), 0.0|0.0   ;;  %vm5246_vm0 = vmmov (!%p410_p3), 0   ;;  %v5247_v1 = vmov (!%p410_p3), 0.0   ;;  %v516_v2 = vld [vmem:[%s5874_s3] sm:$0xff] (!%p410_p3)  ;;  %v517_v3 = vld [vmem:[%s5874_s3 + $0x8] sm:$0xff] (!%p410_p3) }
   0x7   : > { %413 = sbr.rel (%p410_p3) target bundleno = 2247 (0x8c7), region = 68  ;;  %5106 = vmatprep.subr.bf16.mxu0 (!%p410_p3), %v5245_v0  ;;  %5109 = vmatprep.subr.bf16.mxu1 (!%p410_p3), %v5245_v0  ;;  %v518_v4 = vld [vmem:[%s5875_s4] sm:$0xff] (!%p410_p3)  ;;  %v519_v7 = vld [vmem:[%s5875_s4 + $0x8] sm:$0xff] (!%p410_p3)  ;;  %vm522_vm1 = vcmask (!%p410_p3), 130048   ;;  %v5371_v11 = vpack.c.bf16 (!%p410_p3), %v517_v3, %v516_v2  ;;  %vm505_vm2 = vcmask (!%p410_p3), 31744   ;;  %v971_v36 = vld [vmem:[%s5881_s10 + $0x10] sm:$0xff] (!%p410_p3) }
   0x8   : > { %4822 = vmatprep.mubr.msk.f32.mxu0 (!%p410_p3), %vm5246_vm0, %v5247_v1  ;;  %4829 = vmatprep.mubr.msk.f32.mxu1 (!%p410_p3), %vm5246_vm0, %v5247_v1  ;;  %v5364_v9 = vld [vmem:[%s5872_s1] sm:$0xff] (!%p410_p3)  ;;  %v5373_v12 = vpack.c.bf16 (!%p410_p3), %v519_v7, %v518_v4  ;;  %506 = vst.msk [vmem:[#allocation2] sm:$0xff] (!%p410_p3), %vm505_vm2, %v5247_v1  ;;  %507 = vst.msk [vmem:[#allocation2 + $0x8] sm:$0xff] (!%p410_p3), %vm505_vm2, %v5247_v1  ;;  %v970_v35 = vld [vmem:[%s5881_s10 + $0x8] sm:$0xff] (!%p410_p3)  ;;  %vm2491_vm3 = vcmask (!%p410_p3), 64512   ;;  %vm2812_vm4 = vcmask (!%p410_p3), 1043456  }
   0x9   : > { %v5369_v10 = vld [vmem:[%s5873_s2] sm:$0xff] (!%p410_p3)  ;;  %508 = vst.msk [vmem:[#allocation2 + $0x10] sm:$0xff] (!%p410_p3), %vm505_vm2, %v5247_v1  ;;  %509 = vst.msk [vmem:[#allocation2 + $0x18] sm:$0xff] (!%p410_p3), %vm505_vm2, %v5247_v1  ;;  %v972_v37 = vld [vmem:[%s5881_s10 + $0x18] sm:$0xff] (!%p410_p3) }
   0xa   : > { %510 = vst.msk [vmem:[#allocation3] sm:$0xff] (!%p410_p3), %vm505_vm2, %v5247_v1  ;;  %511 = vst.msk [vmem:[#allocation3 + $0x8] sm:$0xff] (!%p410_p3), %vm505_vm2, %v5247_v1  ;;  %v956_v32 = vld [vmem:[%s5880_s9] sm:$0xff] (!%p410_p3)  ;;  %v957_v39 = vld [vmem:[%s5880_s9 + $0x8] sm:$0xff] (!%p410_p3) }
   0xb   : > { %512 = vst.msk [vmem:[#allocation3 + $0x10] sm:$0xff] (!%p410_p3), %vm505_vm2, %v5247_v1  ;;  %513 = vst.msk [vmem:[#allocation3 + $0x18] sm:$0xff] (!%p410_p3), %vm505_vm2, %v5247_v1  ;;  %v969_v33 = vld [vmem:[%s5881_s10] sm:$0xff] (!%p410_p3)  ;;  %v958_v40 = vld [vmem:[%s5880_s9 + $0x10] sm:$0xff] (!%p410_p3) }
   0xc   : > { %v993_v34 = vld [vmem:[%s5882_s11] sm:$0xff] (!%p410_p3)  ;;  %v959_v41 = vld [vmem:[%s5880_s9 + $0x18] sm:$0xff] (!%p410_p3)  ;;  %v994_v42 = vld [vmem:[%s5882_s11 + $0x8] sm:$0xff] (!%p410_p3) }
   0xd   : > { %v995_v43 = vld [vmem:[%s5882_s11 + $0x10] sm:$0xff] (!%p410_p3)  ;;  %v996_v44 = vld [vmem:[%s5882_s11 + $0x18] sm:$0xff] (!%p410_p3) }
   0xe   : > { %s5889_s21 = smov (!%p471_p4, %s5235_s21), 1 }
   0xf   : > { %s4672_s25 = sshll.u32 %s5889_s21, 6  ;;  %v965_v55 = vld [vmem:[#allocation2] sm:$0xff]  ;;  %v966_v56 = vld [vmem:[#allocation2 + $0x8] sm:$0xff] }
  0x10   : > { %s5345_s28 = scalar_lea.vmem %s5871_s0, %s4672_s25  ;;  %v967_v61 = vld [vmem:[#allocation2 + $0x10] sm:$0xff]  ;;  %v968_v62 = vld [vmem:[#allocation2 + $0x18] sm:$0xff]  ;;  %s5802_s18 = scalar_lea.vmem %s5883_s12, %s4672_s25 }
  0x11   : > { %v520_v5 = vld [vmem:[%s5345_s28] sm:$0xff]  ;;  %v521_v6 = vld [vmem:[%s5345_s28 + $0x8] sm:$0xff]  ;;  %v4548_v13 = vld [vmem:[%s5345_s28 + $0x10] sm:$0xff] }
  0x12   : > { %v5107_v8 = vpack.c.bf16 %v521_v6, %v520_v5  ;;  %v4549_v14 = vld [vmem:[%s5345_s28 + $0x18] sm:$0xff]  ;;  %v4568_v25 = vld [vmem:[%s5345_s28 + $0x20] sm:$0xff]  ;;  %v4569_v26 = vld [vmem:[%s5345_s28 + $0x28] sm:$0xff] }
  0x13   : > { %v5125_v15 = vpack.c.bf16 %v4549_v14, %v4548_v13  ;;  %v5143_v29 = vpack.c.bf16 %v4569_v26, %v4568_v25  ;;  %v989_v63 = vld [vmem:[#allocation3] sm:$0xff]  ;;  %v990_v6 = vld [vmem:[#allocation3 + $0x8] sm:$0xff]  ;;  %v991_v7 = vld [vmem:[#allocation3 + $0x10] sm:$0xff] }
  0x14   : > { %5108 = vmatpush3.bf16.msra.mxu0 %v5107_v8  ;;  %5111 = vmatpush3.bf16.msra.mxu1 %v5107_v8  ;;  %v992_v8 = vld [vmem:[#allocation3 + $0x18] sm:$0xff] }
  0x15   : > { %5112 = vmatprep.subr.bf16.mxu0 %v5245_v0  ;;  %5115 = vmatprep.subr.bf16.mxu1 %v5245_v0 }
  0x17   : > { %4823 = vmatmul.mubr.msk.f32.vlgmr.msra.gmra.mrb[0].mxu0 %vm522_vm1, %v5364_v9  ;;  %4830 = vmatmul.mubr.msk.f32.vlgmr.msra.gmra.mrb[0].mxu1 %vm522_vm1, %v5369_v10 }
  0x18   : > { %5114 = vmatpush3.bf16.msra.mxu0 %v5371_v11  ;;  %5117 = vmatpush3.bf16.msra.mxu1 %v5373_v12 }
  0x19   : > { %4836 = vmatprep.mubr.msk.f32.mxu0 %vm5246_vm0, %v5247_v1  ;;  %4843 = vmatprep.mubr.msk.f32.mxu1 %vm5246_vm0, %v5247_v1 }
  0x1a   : > { %5118 = vmatprep.subr.bf16.mxu0 %v5245_v0  ;;  %5124 = vmatprep.subr.bf16.mxu1 %v5245_v0 }
  0xea   : > { %v592_v16 = vpop.f32.mrb[0].mxu0  ;;  %v665_v17 = vpop.f32.mrb[0].mxu1 }
  0xeb   : > { %v4831_v18 = vpop.f32.mrb[1].mxu1  ;;  %4837 = vmatmul.mubr.msk.f32.vlgmr.msra.gmra.mrb[2].mxu0 %vm522_vm1, %v592_v16  ;;  %4844 = vmatmul.mubr.msk.f32.vlgmr.msra.gmra.mrb[2].mxu1 %vm522_vm1, %v665_v17  ;;  %v4824_v19 = vpop.f32.mrb[1].mxu0 }
  0xec   : > { %5120 = vmatpush3.bf16.msra.mxu0 %v5371_v11  ;;  %5126 = vmatpush3.bf16.msra.mxu1 %v5125_v15 }
  0xed   : > { %4850 = vmatprep.mubr.msk.f32.mxu0 %vm5246_vm0, %v5247_v1  ;;  %4864 = vmatprep.mubr.msk.f32.mxu1 %vm5246_vm0, %v5247_v1 }
  0xee   : > { %5127 = vmatprep.subr.bf16.mxu1 %v5245_v0  ;;  %5121 = vmatprep.subr.bf16.mxu0 %v5245_v0 }
  0xef   : > { %4851 = vmatmul.mubr.msk.f32.vlgmr.msra.gmra.mrb[4].mxu0 %vm522_vm1, %v665_v17  ;;  %4865 = vmatmul.mubr.msk.f32.vlgmr.msra.gmra.mrb[4].mxu1 %vm522_vm1, %v5364_v9 }
  0xf0   : > { %5129 = vmatpush3.bf16.msra.mxu1 %v5125_v15  ;;  %4871 = vmatprep.mubr.msk.f32.mxu1 %vm5246_vm0, %v5247_v1 }
  0xf1   : > { %5123 = vmatpush3.bf16.msra.mxu0 %v5373_v12  ;;  %4857 = vmatprep.mubr.msk.f32.mxu0 %vm5246_vm0, %v5247_v1 }
  0xf2   : > { %5130 = vmatprep.subr.bf16.mxu0 %v5245_v0  ;;  %5133 = vmatprep.subr.bf16.mxu1 %v5245_v0 }
  0xf3   : > { %4872 = vmatmul.mubr.msk.f32.vlgmr.msra.gmra.mrb[6].mxu1 %vm522_vm1, %v5369_v10 }
  0xf4   : > { %5135 = vmatpush3.bf16.msra.mxu1 %v5373_v12  ;;  %4885 = vmatprep.mubr.msk.f32.mxu1 %vm5246_vm0, %v5247_v1 }
  0xf5   : > { %5142 = vmatprep.subr.bf16.mxu1 %v5245_v0 }
  0xf7   : > { %4858 = vmatmul.mubr.msk.f32.vlgmr.msra.gmra.mrb[4].mxu0 %vm522_vm1, %v592_v16 }
  0xf8   : > { %5132 = vmatpush3.bf16.msra.mxu0 %v5371_v11  ;;  %4878 = vmatprep.mubr.msk.f32.mxu0 %vm5246_vm0, %v5247_v1 }
  0xf9   : > { %5136 = vmatprep.subr.bf16.mxu0 %v5245_v0 }
 0x1be   : > { %v738_v20 = vpop.f32.mrb[2].mxu0  ;;  %v811_v21 = vpop.f32.mrb[2].mxu1 }
 0x1bf   : > { %v815_v22 = vsub.f32 %v738_v20, %v811_v21  ;;  %v4845_v23 = vpop.f32.mrb[3].mxu1  ;;  %v4838_v24 = vpop.f32.mrb[3].mxu0 }
 0x1c1   : > { %v997_v57 = vmul.f32 %v993_v34, %v815_v22  ;;  %v998_v58 = vmul.f32 %v994_v42, %v815_v22  ;;  %v999_v59 = vmul.f32 %v995_v43, %v815_v22  ;;  %v1000_v60 = vmul.f32 %v996_v44, %v815_v22  ;;  %v4564_v34 = vld [vmem:[%s5882_s11 + $0x20] sm:$0xff]  ;;  %v4557_v42 = vld [vmem:[%s5880_s9 + $0x28] sm:$0xff]  ;;  %v4558_v43 = vld [vmem:[%s5880_s9 + $0x30] sm:$0xff] }
 0x1c2   : > { %v1082_v27 = vpop.f32.mrb[4].mxu1  ;;  %v4559_v44 = vld [vmem:[%s5880_s9 + $0x38] sm:$0xff] }
 0x1c3   : > { %v4866_v28 = vpop.f32.mrb[5].mxu1  ;;  %4879 = vmatmul.mubr.msk.f32.vlgmr.msra.gmra.mrb[6].mxu0 %vm522_vm1, %v1082_v27 }
 0x1c4   : > { %5138 = vmatpush3.bf16.msra.mxu0 %v5371_v11  ;;  %4892 = vmatprep.mubr.msk.f32.mxu0 %vm5246_vm0, %v5247_v1 }
 0x1c5   : > { %5139 = vmatprep.subr.bf16.mxu0 %v5245_v0 }
 0x1c6   : > { %v1152_v30 = vpop.f32.mrb[6].mxu1 }
 0x1c7   : > { %v4873_v31 = vpop.f32.mrb[7].mxu1  ;;  %4886 = vmatmul.mubr.msk.f32.vlgmr.msra.gmra.mrb[8].mxu1 %vm522_vm1, %v1152_v30  ;;  %4893 = vmatmul.mubr.msk.f32.vlgmr.msra.gmra.mrb[8].mxu0 %vm522_vm1, %v1152_v30 }
 0x1c8   : > { %5144 = vmatpush3.bf16.msra.mxu1 %v5143_v29  ;;  %4906 = vmatprep.mubr.msk.f32.mxu1 %vm5246_vm0, %v5247_v1  ;;  %v4588_v31 = vld [vmem:[%s5345_s28 + $0x30] sm:$0xff] }
 0x1c9   : > { %5145 = vmatprep.subr.bf16.mxu1 %v5245_v0  ;;  %5141 = vmatpush3.bf16.msra.mxu0 %v5373_v12 }
 0x1ca   : > { %v952_v38 = vpop.f32.mrb[4].mxu0  ;;  %4899 = vmatprep.mubr.msk.f32.mxu0 %vm5246_vm0, %v5247_v1  ;;  %5148 = vmatprep.subr.bf16.mxu0 %v5245_v0 }
 0x1cb   : > { %v960_v45 = vadd.f32 %v952_v38, %v815_v22  ;;  %v973_v46 = vmul.f32 %v969_v33, %v952_v38  ;;  %v4859_v47 = vpop.f32.mrb[5].mxu0  ;;  %4907 = vmatmul.mubr.msk.f32.vlgmr.msra.gmra.mrb[10].mxu1 %vm522_vm1, %v5364_v9  ;;  %v974_v48 = vmul.f32 %v970_v35, %v952_v38  ;;  %v975_v49 = vmul.f32 %v971_v36, %v952_v38  ;;  %v4556_v35 = vld [vmem:[%s5880_s9 + $0x20] sm:$0xff] }
 0x1cc   : > { %v976_v50 = vmul.f32 %v972_v37, %v952_v38  ;;  %5147 = vmatpush3.bf16.msra.mxu1 %v5143_v29  ;;  %4913 = vmatprep.mubr.msk.f32.mxu1 %vm5246_vm0, %v5247_v1  ;;  %v4560_v36 = vld [vmem:[%s5881_s10 + $0x20] sm:$0xff]  ;;  %v4561_v37 = vld [vmem:[%s5881_s10 + $0x28] sm:$0xff]  ;;  %v4562_v38 = vld [vmem:[%s5881_s10 + $0x30] sm:$0xff] }
 0x1cd   : > { %v961_v51 = vmul.f32 %v960_v45, %v956_v32  ;;  %v962_v52 = vmul.f32 %v960_v45, %v957_v39  ;;  %v963_v53 = vmul.f32 %v960_v45, %v958_v40  ;;  %v964_v54 = vmul.f32 %v960_v45, %v959_v41  ;;  %5151 = vmatprep.subr.bf16.mxu1 %v5245_v0  ;;  %v4589_v32 = vld [vmem:[%s5345_s28 + $0x38] sm:$0xff]  ;;  %v4565_v45 = vld [vmem:[%s5882_s11 + $0x28] sm:$0xff] }
 0x1ce   : > { %v4563_v39 = vld [vmem:[%s5881_s10 + $0x38] sm:$0xff]  ;;  %v5161_v40 = vpack.c.bf16 %v4589_v32, %v4588_v31 }
 0x1cf   : > { %v977_v2 = vsub.f32 %v961_v51, %v973_v46  ;;  %v978_v3 = vsub.f32 %v962_v52, %v974_v48  ;;  %v979_v4 = vsub.f32 %v963_v53, %v975_v49  ;;  %v980_v5 = vsub.f32 %v964_v54, %v976_v50  ;;  %4900 = vmatmul.mubr.msk.f32.vlgmr.msra.gmra.mrb[8].mxu0 %vm522_vm1, %v1082_v27  ;;  %v4566_v46 = vld [vmem:[%s5882_s11 + $0x30] sm:$0xff]  ;;  %v4567_v47 = vld [vmem:[%s5882_s11 + $0x38] sm:$0xff] }
 0x1d0   : > { %v1001_v13 = vadd.f32 %v997_v57, %v961_v51  ;;  %v1002_v14 = vadd.f32 %v998_v58, %v962_v52  ;;  %v1003_v15 = vadd.f32 %v999_v59, %v963_v53  ;;  %v1004_v16 = vadd.f32 %v1000_v60, %v964_v54  ;;  %4914 = vmatmul.mubr.msk.f32.vlgmr.msra.gmra.mrb[12].mxu1 %vm522_vm1, %v5369_v10 }
 0x1d1   : > { %v981_v17 = vadd.f32 %v977_v2, %v965_v55  ;;  %v982_v18 = vadd.f32 %v978_v3, %v966_v56  ;;  %v983_v19 = vadd.f32 %v979_v4, %v967_v61  ;;  %v984_v20 = vadd.f32 %v980_v5, %v968_v62  ;;  %5150 = vmatpush3.bf16.msra.mxu0 %v5371_v11 }
 0x1d2   : > { %v1005_v21 = vadd.f32 %v1001_v13, %v989_v63  ;;  %v1006_v22 = vadd.f32 %v1002_v14, %v990_v6  ;;  %v1007_v23 = vadd.f32 %v1003_v15, %v991_v7  ;;  %v1008_v24 = vadd.f32 %v1004_v16, %v992_v8  ;;  %4920 = vmatprep.mubr.msk.f32.mxu0 %vm5246_vm0, %v5247_v1 }
 0x1d3   : > { %985 = vst.msk [vmem:[#allocation2] sm:$0xff] %vm505_vm2, %v981_v17  ;;  %986 = vst.msk [vmem:[#allocation2 + $0x8] sm:$0xff] %vm505_vm2, %v982_v18  ;;  %5154 = vmatprep.subr.bf16.mxu0 %v5245_v0  ;;  %5153 = vmatpush3.bf16.msra.mxu1 %v5373_v12 }
 0x1d4   : > { %987 = vst.msk [vmem:[#allocation2 + $0x10] sm:$0xff] %vm505_vm2, %v983_v19  ;;  %988 = vst.msk [vmem:[#allocation2 + $0x18] sm:$0xff] %vm505_vm2, %v984_v20  ;;  %4927 = vmatprep.mubr.msk.f32.mxu1 %vm5246_vm0, %v5247_v1  ;;  %5160 = vmatprep.subr.bf16.mxu1 %v5245_v0 }
 0x1d5   : > { %1009 = vst.msk [vmem:[#allocation3] sm:$0xff] %vm505_vm2, %v1005_v21  ;;  %1010 = vst.msk [vmem:[#allocation3 + $0x8] sm:$0xff] %vm505_vm2, %v1006_v22 }
 0x1d6   : > { %1011 = vst.msk [vmem:[#allocation3 + $0x10] sm:$0xff] %vm505_vm2, %v1007_v23  ;;  %1012 = vst.msk [vmem:[#allocation3 + $0x18] sm:$0xff] %vm505_vm2, %v1008_v24 }
 0x1da   : > { %v1453_v2 = vld [vmem:[#allocation2] sm:$0xff]  ;;  %v1454_v3 = vld [vmem:[#allocation2 + $0x8] sm:$0xff] }
 0x1db   : > { %v1455_v8 = vld [vmem:[#allocation2 + $0x10] sm:$0xff]  ;;  %v1456_v13 = vld [vmem:[#allocation2 + $0x18] sm:$0xff] }
 0x1dc   : > { %v1478_v14 = vld [vmem:[#allocation3] sm:$0xff]  ;;  %v1479_v23 = vld [vmem:[#allocation3 + $0x8] sm:$0xff] }
 0x1dd   : > { %v1480_v24 = vld [vmem:[#allocation3 + $0x10] sm:$0xff] }
 0x296   : > { %v1225_v25 = vpop.f32.mrb[6].mxu0 }
 0x297   : > { %v4880_v26 = vpop.f32.mrb[7].mxu0 }
 0x29a   : > { %v1298_v27 = vpop.f32.mrb[8].mxu1 }
 0x29b   : > { %v1302_v28 = vsub.f32 %v1225_v25, %v1298_v27  ;;  %v4887_v29 = vpop.f32.mrb[9].mxu1  ;;  %v1481_v25 = vld [vmem:[#allocation3 + $0x18] sm:$0xff] }
 0x29d   : > { %v1487_v48 = vmul.f32 %v4564_v34, %v1302_v28  ;;  %v1488_v61 = vmul.f32 %v4565_v45, %v1302_v28  ;;  %v1489_v62 = vmul.f32 %v4566_v46, %v1302_v28  ;;  %v1490_v63 = vmul.f32 %v4567_v47, %v1302_v28  ;;  %v4585_v45 = vld [vmem:[%s5882_s11 + $0x48] sm:$0xff]  ;;  %v4587_v46 = vld [vmem:[%s5882_s11 + $0x58] sm:$0xff] }
 0x29e   : > { %v5513_v30 = vpop.f32.mrb[10].mxu1 }
 0x29f   : > { %v4908_v33 = vpop.f32.mrb[11].mxu1  ;;  %4921 = vmatmul.mubr.msk.f32.vlgmr.msra.gmra.mrb[10].mxu0 %vm522_vm1, %v5513_v30 }
 0x2a0   : > { %5156 = vmatpush3.bf16.msra.mxu0 %v5371_v11  ;;  %4934 = vmatprep.mubr.msk.f32.mxu0 %vm5246_vm0, %v5247_v1 }
 0x2a1   : > { %5157 = vmatprep.subr.bf16.mxu0 %v5245_v0 }
 0x2a2   : > { %v1439_v41 = vpop.f32.mrb[8].mxu0 }
 0x2a3   : > { %v1448_v49 = vadd.f32 %v1439_v41, %v1302_v28  ;;  %v1462_v50 = vmul.f32 %v4560_v36, %v1439_v41  ;;  %v1642_v51 = vpop.f32.mrb[12].mxu1  ;;  %v4901_v52 = vpop.f32.mrb[9].mxu0  ;;  %v1463_v53 = vmul.f32 %v4561_v37, %v1439_v41  ;;  %v1464_v54 = vmul.f32 %v4562_v38, %v1439_v41  ;;  %v4580_v36 = vld [vmem:[%s5881_s10 + $0x40] sm:$0xff]  ;;  %v4581_v38 = vld [vmem:[%s5881_s10 + $0x48] sm:$0xff] }
 0x2a4   : > { %v1465_v55 = vmul.f32 %v4563_v39, %v1439_v41  ;;  %v4915_v56 = vpop.f32.mrb[13].mxu1  ;;  %4928 = vmatmul.mubr.msk.f32.vlgmr.msra.gmra.mrb[14].mxu1 %vm522_vm1, %v1642_v51  ;;  %4935 = vmatmul.mubr.msk.f32.vlgmr.msra.gmra.mrb[12].mxu0 %vm522_vm1, %v1642_v51  ;;  %v4584_v37 = vld [vmem:[%s5882_s11 + $0x40] sm:$0xff]  ;;  %v4583_v39 = vld [vmem:[%s5881_s10 + $0x58] sm:$0xff]  ;;  %v4577_v41 = vld [vmem:[%s5880_s9 + $0x48] sm:$0xff] }
 0x2a5   : > { %v1449_v57 = vmul.f32 %v4556_v35, %v1448_v49  ;;  %v1450_v58 = vmul.f32 %v4557_v42, %v1448_v49  ;;  %v1451_v59 = vmul.f32 %v4558_v43, %v1448_v49  ;;  %v1452_v60 = vmul.f32 %v4559_v44, %v1448_v49  ;;  %5162 = vmatpush3.bf16.msra.mxu1 %v5161_v40  ;;  %v4576_v35 = vld [vmem:[%s5880_s9 + $0x40] sm:$0xff]  ;;  %v4578_v42 = vld [vmem:[%s5880_s9 + $0x50] sm:$0xff]  ;;  %v4579_v43 = vld [vmem:[%s5880_s9 + $0x58] sm:$0xff] }
 0x2a6   : > { %4948 = vmatprep.mubr.msk.f32.mxu1 %vm5246_vm0, %v5247_v1  ;;  %5163 = vmatprep.subr.bf16.mxu1 %v5245_v0 }
 0x2a7   : > { %v1466_v4 = vsub.f32 %v1449_v57, %v1462_v50  ;;  %v1467_v5 = vsub.f32 %v1450_v58, %v1463_v53  ;;  %v1468_v6 = vsub.f32 %v1451_v59, %v1464_v54  ;;  %v1469_v7 = vsub.f32 %v1452_v60, %v1465_v55  ;;  %5159 = vmatpush3.bf16.msra.mxu0 %v5373_v12 }
 0x2a8   : > { %v1491_v15 = vadd.f32 %v1487_v48, %v1449_v57  ;;  %v1492_v16 = vadd.f32 %v1488_v61, %v1450_v58  ;;  %v1493_v17 = vadd.f32 %v1489_v62, %v1451_v59  ;;  %v1494_v18 = vadd.f32 %v1490_v63, %v1452_v60  ;;  %4949 = vmatmul.mubr.msk.f32.vlgmr.msra.gmra.mrb[16].mxu1 %vm522_vm1, %v5364_v9 }
 0x2a9   : > { %v1470_v19 = vadd.f32 %v1466_v4, %v1453_v2  ;;  %v1471_v20 = vadd.f32 %v1467_v5, %v1454_v3  ;;  %v1472_v21 = vadd.f32 %v1468_v6, %v1455_v8  ;;  %v1473_v22 = vadd.f32 %v1469_v7, %v1456_v13  ;;  %5165 = vmatpush3.bf16.msra.mxu1 %v5161_v40 }
 0x2aa   : > { %v1495_v26 = vadd.f32 %v1491_v15, %v1478_v14  ;;  %v1496_v27 = vadd.f32 %v1492_v16, %v1479_v23  ;;  %v1497_v28 = vadd.f32 %v1493_v17, %v1480_v24  ;;  %v1498_v29 = vadd.f32 %v1494_v18, %v1481_v25  ;;  %4941 = vmatprep.mubr.msk.f32.mxu0 %vm5246_vm0, %v5247_v1 }
 0x2ab   : > { %1474 = vst.msk [vmem:[#allocation2] sm:$0xff] %vm505_vm2, %v1470_v19  ;;  %1475 = vst.msk [vmem:[#allocation2 + $0x8] sm:$0xff] %vm505_vm2, %v1471_v20  ;;  %4955 = vmatprep.mubr.msk.f32.mxu1 %vm5246_vm0, %v5247_v1  ;;  %5166 = vmatprep.subr.bf16.mxu0 %v5245_v0 }
 0x2ac   : > { %1476 = vst.msk [vmem:[#allocation2 + $0x10] sm:$0xff] %vm505_vm2, %v1472_v21  ;;  %1477 = vst.msk [vmem:[#allocation2 + $0x18] sm:$0xff] %vm505_vm2, %v1473_v22  ;;  %4942 = vmatmul.mubr.msk.f32.vlgmr.msra.gmra.mrb[12].mxu0 %vm522_vm1, %v5513_v30  ;;  %4956 = vmatmul.mubr.msk.f32.vlgmr.msra.gmra.mrb[18].mxu1 %vm522_vm1, %v5369_v10 }
 0x2ad   : > { %1499 = vst.msk [vmem:[#allocation3] sm:$0xff] %vm505_vm2, %v1495_v26  ;;  %1500 = vst.msk [vmem:[#allocation3 + $0x8] sm:$0xff] %vm505_vm2, %v1496_v27  ;;  %5168 = vmatpush3.bf16.msra.mxu0 %v5371_v11  ;;  %4962 = vmatprep.mubr.msk.f32.mxu0 %vm5246_vm0, %v5247_v1  ;;  %v5654_v26 = vld [vmem:[%s5876_s5] sm:$0xff] }
 0x2ae   : > { %1501 = vst.msk [vmem:[#allocation3 + $0x10] sm:$0xff] %vm505_vm2, %v1497_v28  ;;  %1502 = vst.msk [vmem:[#allocation3 + $0x18] sm:$0xff] %vm505_vm2, %v1498_v29  ;;  %5169 = vmatprep.subr.bf16.mxu1 %v5245_v0  ;;  %5172 = vmatprep.subr.bf16.mxu0 %v5245_v0  ;;  %v5659_v27 = vld [vmem:[%s5877_s6] sm:$0xff] }
 0x2af   : > { %5171 = vmatpush3.bf16.msra.mxu1 %v5373_v12  ;;  %4969 = vmatprep.mubr.msk.f32.mxu1 %vm5246_vm0, %v5247_v1 }
 0x2b2   : > { %v1943_v62 = vld [vmem:[#allocation2] sm:$0xff]  ;;  %v1944_v63 = vld [vmem:[#allocation2 + $0x8] sm:$0xff] }
 0x2b3   : > { %v1945_v6 = vld [vmem:[#allocation2 + $0x10] sm:$0xff]  ;;  %v1946_v7 = vld [vmem:[#allocation2 + $0x18] sm:$0xff] }
 0x2b4   : > { %v1968_v8 = vld [vmem:[#allocation3] sm:$0xff]  ;;  %v1969_v20 = vld [vmem:[#allocation3 + $0x8] sm:$0xff] }
 0x2b5   : > { %v1970_v21 = vld [vmem:[#allocation3 + $0x10] sm:$0xff] }
 0x372   : > { %v1715_v9 = vpop.f32.mrb[10].mxu0 }
 0x373   : > { %v4922_v31 = vpop.f32.mrb[11].mxu0 }
 0x377   : > { %v1788_v30 = vpop.f32.mrb[14].mxu1 }
 0x378   : > { %v1792_v32 = vsub.f32 %v1715_v9, %v1788_v30  ;;  %v4929_v33 = vpop.f32.mrb[15].mxu1 }
 0x379   : > { %v4600_v33 = vld [vmem:[%s5881_s10 + $0x60] sm:$0xff] }
 0x37a   : > { %v1977_v58 = vmul.f32 %v4584_v37, %v1792_v32  ;;  %v1978_v59 = vmul.f32 %v4585_v45, %v1792_v32  ;;  %v1980_v61 = vmul.f32 %v4587_v46, %v1792_v32 }
 0x37b   : > { %v5592_v10 = vpop.f32.mrb[16].mxu1 }
 0x37c   : > { %v4950_v34 = vpop.f32.mrb[17].mxu1  ;;  %4963 = vmatmul.mubr.msk.f32.vlgmr.msra.gmra.mrb[14].mxu0 %vm522_vm1, %v5592_v10 }
 0x37d   : > { %5174 = vmatpush3.bf16.msra.mxu0 %v5371_v11  ;;  %4976 = vmatprep.mubr.msk.f32.mxu0 %vm5246_vm0, %v5247_v1  ;;  %v4582_v11 = vld [vmem:[%s5881_s10 + $0x50] sm:$0xff]  ;;  %v4601_v34 = vld [vmem:[%s5881_s10 + $0x68] sm:$0xff] }
 0x37e   : > { %5175 = vmatprep.subr.bf16.mxu0 %v5245_v0  ;;  %v4586_v0 = vld [vmem:[%s5882_s11 + $0x50] sm:$0xff] }
 0x37f   : > { %v1929_v40 = vpop.f32.mrb[12].mxu0  ;;  %v2132_v44 = vpop.f32.mrb[18].mxu1  ;;  %v1979_v60 = vmul.f32 %v4586_v0, %v1792_v32 }
 0x380   : > { %v1938_v47 = vadd.f32 %v1929_v40, %v1792_v32  ;;  %v4943_v48 = vpop.f32.mrb[13].mxu0  ;;  %v4957_v49 = vpop.f32.mrb[19].mxu1  ;;  %4970 = vmatmul.mubr.msk.f32.vlgmr.msra.gmra.mrb[20].mxu1 %vm522_vm1, %v2132_v44  ;;  %v1952_v50 = vmul.f32 %v4580_v36, %v1929_v40  ;;  %v1953_v51 = vmul.f32 %v4581_v38, %v1929_v40  ;;  %v1954_v52 = vmul.f32 %v4582_v11, %v1929_v40  ;;  %v4596_v32 = vld [vmem:[%s5880_s9 + $0x60] sm:$0xff]  ;;  %v4603_v36 = vld [vmem:[%s5881_s10 + $0x78] sm:$0xff]  ;;  %v4597_v38 = vld [vmem:[%s5880_s9 + $0x68] sm:$0xff] }
 0x381   : > { %v1955_v53 = vmul.f32 %v4583_v39, %v1929_v40  ;;  %4977 = vmatmul.mubr.msk.f32.vlgmr.msra.gmra.mrb[16].mxu0 %vm522_vm1, %v2132_v44  ;;  %4988 = vmatprep.mubr.msk.f32.mxu1 %vm2491_vm3, %v5654_v26  ;;  %v4598_v11 = vld [vmem:[%s5880_s9 + $0x70] sm:$0xff]  ;;  %v4599_v39 = vld [vmem:[%s5880_s9 + $0x78] sm:$0xff]  ;;  %v4605_v40 = vld [vmem:[%s5882_s11 + $0x68] sm:$0xff] }
 0x382   : > { %v1939_v54 = vmul.f32 %v4576_v35, %v1938_v47  ;;  %v1940_v55 = vmul.f32 %v4577_v41, %v1938_v47  ;;  %v1941_v56 = vmul.f32 %v4578_v42, %v1938_v47  ;;  %v1942_v57 = vmul.f32 %v4579_v43, %v1938_v47  ;;  %5177 = vmatpush3.bf16.msra.mxu0 %v5373_v12  ;;  %v4602_v35 = vld [vmem:[%s5881_s10 + $0x70] sm:$0xff]  ;;  %v4607_v42 = vld [vmem:[%s5882_s11 + $0x78] sm:$0xff] }
 0x383   : > { %4983 = vmatprep.mubr.msk.f32.mxu0 %vm5246_vm0, %v5247_v1  ;;  %v1971_v1 = vld [vmem:[#allocation3 + $0x18] sm:$0xff]  ;;  %v4606_v41 = vld [vmem:[%s5882_s11 + $0x70] sm:$0xff] }
 0x384   : > { %v1956_v2 = vsub.f32 %v1939_v54, %v1952_v50  ;;  %v1957_v3 = vsub.f32 %v1940_v55, %v1953_v51  ;;  %v1958_v4 = vsub.f32 %v1941_v56, %v1954_v52  ;;  %v1959_v5 = vsub.f32 %v1942_v57, %v1955_v53 }
 0x385   : > { %v1981_v13 = vadd.f32 %v1977_v58, %v1939_v54  ;;  %v1982_v14 = vadd.f32 %v1978_v59, %v1940_v55  ;;  %v1983_v15 = vadd.f32 %v1979_v60, %v1941_v56  ;;  %v1984_v12 = vadd.f32 %v1980_v61, %v1942_v57 }
 0x386   : > { %v1960_v16 = vadd.f32 %v1956_v2, %v1943_v62  ;;  %v1961_v17 = vadd.f32 %v1957_v3, %v1944_v63  ;;  %v1962_v18 = vadd.f32 %v1958_v4, %v1945_v6  ;;  %v1963_v19 = vadd.f32 %v1959_v5, %v1946_v7 }
 0x387   : > { %v1985_v22 = vadd.f32 %v1981_v13, %v1968_v8  ;;  %v1986_v23 = vadd.f32 %v1982_v14, %v1969_v20  ;;  %v1987_v24 = vadd.f32 %v1983_v15, %v1970_v21  ;;  %v1988_v25 = vadd.f32 %v1984_v12, %v1971_v1  ;;  %v2484_v1 = vld [vmem:[%s5876_s5 + $0x8] sm:$0xff] }
 0x388   : > { %1964 = vst.msk [vmem:[#allocation2] sm:$0xff] %vm505_vm2, %v1960_v16  ;;  %1965 = vst.msk [vmem:[#allocation2 + $0x8] sm:$0xff] %vm505_vm2, %v1961_v17 }
 0x389   : > { %1966 = vst.msk [vmem:[#allocation2 + $0x10] sm:$0xff] %vm505_vm2, %v1962_v18  ;;  %1967 = vst.msk [vmem:[#allocation2 + $0x18] sm:$0xff] %vm505_vm2, %v1963_v19  ;;  %4984 = vmatmul.mubr.msk.f32.vlgmr.msra.gmra.mrb[16].mxu0 %vm522_vm1, %v5592_v10  ;;  %v4604_v10 = vld [vmem:[%s5882_s11 + $0x60] sm:$0xff] }
 0x38a   : > { %1989 = vst.msk [vmem:[#allocation3] sm:$0xff] %vm505_vm2, %v1985_v22  ;;  %1990 = vst.msk [vmem:[#allocation3 + $0x8] sm:$0xff] %vm505_vm2, %v1986_v23  ;;  %4998 = vmatprep.mubr.msk.f32.mxu0 %vm2491_vm3, %v5659_v27  ;;  %v5715_v22 = vld [vmem:[%s5877_s6 + $0x8] sm:$0xff] }
 0x38b   : > { %1991 = vst.msk [vmem:[#allocation3 + $0x10] sm:$0xff] %vm505_vm2, %v1987_v24  ;;  %1992 = vst.msk [vmem:[#allocation3 + $0x18] sm:$0xff] %vm505_vm2, %v1988_v25 }
 0x38f   : > { %v2433_v56 = vld [vmem:[#allocation2] sm:$0xff]  ;;  %v2434_v57 = vld [vmem:[#allocation2 + $0x8] sm:$0xff] }
 0x390   : > { %v2435_v62 = vld [vmem:[#allocation2 + $0x10] sm:$0xff]  ;;  %v2436_v63 = vld [vmem:[#allocation2 + $0x18] sm:$0xff] }
 0x391   : > { %v2458_v2 = vld [vmem:[#allocation3] sm:$0xff]  ;;  %v2459_v15 = vld [vmem:[#allocation3 + $0x8] sm:$0xff] }
 0x392   : > { %v2460_v12 = vld [vmem:[#allocation3 + $0x10] sm:$0xff]  ;;  %v2461_v16 = vld [vmem:[#allocation3 + $0x18] sm:$0xff] }
 0x44f   : > { %v2205_v28 = vpop.f32.mrb[14].mxu0 }
 0x450   : > { %v4964_v29 = vpop.f32.mrb[15].mxu0 }
 0x453   : > { %v2278_v9 = vpop.f32.mrb[20].mxu1 }
 0x454   : > { %v2282_v31 = vsub.f32 %v2205_v28, %v2278_v9  ;;  %v4971_v30 = vpop.f32.mrb[21].mxu1 }
 0x455   : > { %v5768_v30 = vld [vmem:[%s5878_s7] sm:$0xf] }
 0x456   : > { %v2467_v52 = vmul.f32 %v4604_v10, %v2282_v31  ;;  %v2468_v53 = vmul.f32 %v4605_v40, %v2282_v31  ;;  %v2469_v54 = vmul.f32 %v4606_v41, %v2282_v31  ;;  %v2470_v55 = vmul.f32 %v4607_v42, %v2282_v31 }
 0x45c   : > { %v2419_v37 = vpop.f32.mrb[16].mxu0 }
 0x45d   : > { %v2428_v43 = vadd.f32 %v2419_v37, %v2282_v31  ;;  %v4985_v44 = vpop.f32.mrb[17].mxu0  ;;  %v2442_v45 = vmul.f32 %v4600_v33, %v2419_v37  ;;  %v2443_v0 = vmul.f32 %v4601_v34, %v2419_v37  ;;  %v2444_v46 = vmul.f32 %v4602_v35, %v2419_v37 }
 0x45e   : > { %v2445_v47 = vmul.f32 %v4603_v36, %v2419_v37 }
 0x45f   : > { %v2429_v48 = vmul.f32 %v4596_v32, %v2428_v43  ;;  %v2430_v49 = vmul.f32 %v4597_v38, %v2428_v43  ;;  %v2431_v50 = vmul.f32 %v4598_v11, %v2428_v43  ;;  %v2432_v51 = vmul.f32 %v4599_v39, %v2428_v43  ;;  %v5777_v32 = vld [vmem:[%s5879_s8] sm:$0xf] }
 0x461   : > { %v2446_v58 = vsub.f32 %v2429_v48, %v2442_v45  ;;  %v2447_v59 = vsub.f32 %v2430_v49, %v2443_v0  ;;  %v2448_v60 = vsub.f32 %v2431_v50, %v2444_v46  ;;  %v2449_v61 = vsub.f32 %v2432_v51, %v2445_v47 }
 0x462   : > { %v2471_v3 = vadd.f32 %v2467_v52, %v2429_v48  ;;  %v2472_v4 = vadd.f32 %v2468_v53, %v2430_v49  ;;  %v2473_v5 = vadd.f32 %v2469_v54, %v2431_v50  ;;  %v2474_v6 = vadd.f32 %v2470_v55, %v2432_v51 }
 0x463   : > { %v2450_v7 = vadd.f32 %v2446_v58, %v2433_v56  ;;  %v2451_v8 = vadd.f32 %v2447_v59, %v2434_v57  ;;  %v2452_v13 = vadd.f32 %v2448_v60, %v2435_v62  ;;  %v2453_v14 = vadd.f32 %v2449_v61, %v2436_v63 }
 0x464   : > { %v2475_v17 = vadd.f32 %v2471_v3, %v2458_v2  ;;  %v2476_v18 = vadd.f32 %v2472_v4, %v2459_v15  ;;  %v2477_v19 = vadd.f32 %v2473_v5, %v2460_v12  ;;  %v2478_v20 = vadd.f32 %v2474_v6, %v2461_v16 }
 0x465   : > { %2454 = vst.msk [vmem:[#allocation2] sm:$0xff] %vm505_vm2, %v2450_v7  ;;  %2455 = vst.msk [vmem:[#allocation2 + $0x8] sm:$0xff] %vm505_vm2, %v2451_v8 }
 0x466   : > { %2456 = vst.msk [vmem:[#allocation2 + $0x10] sm:$0xff] %vm505_vm2, %v2452_v13  ;;  %2457 = vst.msk [vmem:[#allocation2 + $0x18] sm:$0xff] %vm505_vm2, %v2453_v14 }
 0x467   : > { %2479 = vst.msk [vmem:[#allocation3] sm:$0xff] %vm505_vm2, %v2475_v17  ;;  %2480 = vst.msk [vmem:[#allocation3 + $0x8] sm:$0xff] %vm505_vm2, %v2476_v18 }
 0x468   : > { %2481 = vst.msk [vmem:[#allocation3 + $0x10] sm:$0xff] %vm505_vm2, %v2477_v19  ;;  %2482 = vst.msk [vmem:[#allocation3 + $0x18] sm:$0xff] %vm505_vm2, %v2478_v20 }
 0x46c   : > { %v2489_v21 = vld [vmem:[#allocation2] sm:$0xff]  ;;  %v2980_v24 = vld [vmem:[#allocation2 + $0x8] sm:$0xff] }
 0x46d   : > { %4986 = vmatprep.subr.mxu1 %v2489_v21  ;;  %4996 = vmatprep.subr.mxu0 %v2489_v21  ;;  %v3453_v28 = vld [vmem:[#allocation2 + $0x10] sm:$0xff]  ;;  %v3926_v9 = vld [vmem:[#allocation2 + $0x18] sm:$0xff] }
 0x46e   : > { %4987 = vmatpush3.msra.mxu1 %v2489_v21  ;;  %4997 = vmatpush3.msra.mxu0 %v2489_v21  ;;  %v2490_v23 = vld [vmem:[#allocation3] sm:$0xff]  ;;  %v2982_v25 = vld [vmem:[#allocation3 + $0x8] sm:$0xff] }
 0x46f   : > { %4989 = vmatmul.mubr.msk.f32.vlgmr.msra.gmra.mrb[22].mxu1 %vm2491_vm3, %v2484_v1  ;;  %4991 = vmatprep.subr.mxu1 %v2490_v23  ;;  %v5740_v29 = vld [vmem:[#allocation3 + $0x10] sm:$0xff]  ;;  %v5754_v31 = vld [vmem:[#allocation3 + $0x18] sm:$0xff] }
 0x470   : > { %4999 = vmatmul.mubr.msk.f32.vlgmr.msra.gmra.mrb[18].mxu0 %vm2491_vm3, %v5715_v22  ;;  %5001 = vmatprep.subr.mxu0 %v2490_v23 }
 0x471   : > { %4992 = vmatpush3.msra.mxu1 %v2490_v23  ;;  %5002 = vmatpush3.msra.mxu0 %v2490_v23 }
 0x472   : > { %5016 = vmatprep.subr.mxu0 %v2980_v24  ;;  %4993 = vmatprep.mubr.msk.f32.mxu1 %vm2491_vm3, %v5659_v27 }
 0x473   : > { %4994 = vmatmul.mubr.msk.f32.vlgmr.msra.gmra.mrb[24].mxu1 %vm2491_vm3, %v5715_v22  ;;  %5003 = vmatprep.mubr.msk.f32.mxu0 %vm2491_vm3, %v5654_v26 }
 0x474   : > { %5006 = vmatprep.subr.msk.mxu1 %vm2812_vm4, %v5768_v30 }
 0x475   : > { %5007 = vmatpush3.msk.msra.mxu1 %vm2812_vm4, %v5768_v30 }
 0x476   : > { %5011 = vmatprep.subr.msk.mxu1 %vm2812_vm4, %v5777_v32 }
 0x478   : > { %5004 = vmatmul.mubr.msk.f32.vlgmr.msra.gmra.mrb[18].mxu0 %vm2491_vm3, %v2484_v1 }
 0x479   : > { %5017 = vmatpush3.msra.mxu0 %v2980_v24  ;;  %5018 = vmatprep.mubr.msk.f32.mxu0 %vm2491_vm3, %v5654_v26 }
 0x47a   : > { %5026 = vmatprep.subr.mxu0 %v2980_v24 }
 0x47c   : > { %5019 = vmatmul.mubr.msk.f32.vlgmr.msra.gmra.mrb[20].mxu0 %vm2491_vm3, %v2484_v1 }
 0x47d   : > { %5027 = vmatpush3.msra.mxu0 %v2980_v24  ;;  %5028 = vmatprep.mubr.msk.f32.mxu0 %vm2491_vm3, %v5659_v27 }
 0x47e   : > { %5031 = vmatprep.subr.mxu0 %v2982_v25 }
 0x480   : > { %5029 = vmatmul.mubr.msk.f32.vlgmr.msra.gmra.mrb[22].mxu0 %vm2491_vm3, %v5715_v22 }
 0x481   : > { %5032 = vmatpush3.msra.mxu0 %v2982_v25  ;;  %5033 = vmatprep.mubr.msk.f32.mxu0 %vm2491_vm3, %v5654_v26 }
 0x482   : > { %5046 = vmatprep.subr.mxu0 %v3453_v28 }
 0x488   : > { %5034 = vmatmul.mubr.msk.f32.vlgmr.msra.gmra.mrb[22].mxu0 %vm2491_vm3, %v2484_v1 }
 0x489   : > { %5047 = vmatpush3.msra.mxu0 %v3453_v28  ;;  %5048 = vmatprep.mubr.msk.f32.mxu0 %vm2491_vm3, %v5654_v26 }
 0x48a   : > { %5056 = vmatprep.subr.mxu0 %v3453_v28 }
 0x48c   : > { %5049 = vmatmul.mubr.msk.f32.vlgmr.msra.gmra.mrb[24].mxu0 %vm2491_vm3, %v2484_v1 }
 0x48d   : > { %5057 = vmatpush3.msra.mxu0 %v3453_v28  ;;  %5058 = vmatprep.mubr.msk.f32.mxu0 %vm2491_vm3, %v5659_v27 }
 0x48e   : > { %5061 = vmatprep.subr.mxu0 %v5740_v29 }
 0x490   : > { %5059 = vmatmul.mubr.msk.f32.vlgmr.msra.gmra.mrb[26].mxu0 %vm2491_vm3, %v5715_v22 }
 0x491   : > { %5062 = vmatpush3.msra.mxu0 %v5740_v29  ;;  %5063 = vmatprep.mubr.msk.f32.mxu0 %vm2491_vm3, %v5654_v26 }
 0x492   : > { %5076 = vmatprep.subr.mxu0 %v3926_v9 }
 0x498   : > { %5064 = vmatmul.mubr.msk.f32.vlgmr.msra.gmra.mrb[26].mxu0 %vm2491_vm3, %v2484_v1 }
 0x499   : > { %5077 = vmatpush3.msra.mxu0 %v3926_v9  ;;  %5078 = vmatprep.mubr.msk.f32.mxu0 %vm2491_vm3, %v5654_v26 }
 0x49a   : > { %5086 = vmatprep.subr.mxu0 %v3926_v9 }
 0x49c   : > { %5079 = vmatmul.mubr.msk.f32.vlgmr.msra.gmra.mrb[28].mxu0 %vm2491_vm3, %v2484_v1 }
 0x49d   : > { %5087 = vmatpush3.msra.mxu0 %v3926_v9  ;;  %5088 = vmatprep.mubr.msk.f32.mxu0 %vm2491_vm3, %v5659_v27 }
 0x49e   : > { %5091 = vmatprep.subr.mxu0 %v5754_v31 }
 0x4a0   : > { %5089 = vmatmul.mubr.msk.f32.vlgmr.msra.gmra.mrb[30].mxu0 %vm2491_vm3, %v5715_v22 }
 0x4a1   : > { %5092 = vmatpush3.msra.mxu0 %v5754_v31  ;;  %5093 = vmatprep.mubr.msk.f32.mxu0 %vm2491_vm3, %v5654_v26 }
 0x4a8   : > { %5094 = vmatmul.mubr.msk.f32.vlgmr.msra.gmra.mrb[30].mxu0 %vm2491_vm3, %v2484_v1 }
 0x542   : > { %v4990_v26 = vpop.f32.mrb[22].mxu1 }
 0x543   : > { %v2564_v33 = vpop.f32.mrb[23].mxu1 }
 0x546   : > { %v4995_v10 = vpop.f32.mrb[24].mxu1 }
 0x547   : > { %v2655_v34 = vsub.f32 %v4990_v26, %v4995_v10  ;;  %v2645_v35 = vpop.f32.mrb[25].mxu1 }
 0x548   : > { %v2654_v36 = vsub.f32 %v2564_v33, %v2645_v35 }
 0x54a   : > { %5008 = vmatprep.mubr.msk.f32.mxu1 %vm505_vm2, %v2654_v36 }
 0x54b   : > { %v5005_v37 = vpop.f32.mrb[18].mxu0  ;;  %5009 = vmatmul.mubr.msk.f32.vlgmr.msra.gmra.mrb[26].mxu1 %vm505_vm2, %v2655_v34 }
 0x54c   : > { %v2797_v38 = vpop.f32.mrb[19].mxu0  ;;  %5012 = vmatpush3.msk.msra.mxu1 %vm2812_vm4, %v5777_v32 }
 0x54d   : > { %5013 = vmatprep.mubr.msk.f32.mxu1 %vm505_vm2, %v2797_v38  ;;  %5021 = vmatprep.subr.mxu1 %v2982_v25 }
 0x54f   : > { %5014 = vmatmul.mubr.msk.f32.vlgmr.msra.gmra.mrb[28].mxu1 %vm505_vm2, %v5005_v37  ;;  %v5020_v11 = vpop.f32.mrb[20].mxu0 }
 0x550   : > { %5022 = vmatpush3.msra.mxu1 %v2982_v25  ;;  %5023 = vmatprep.mubr.msk.f32.mxu1 %vm2491_vm3, %v5659_v27  ;;  %v3049_v39 = vpop.f32.mrb[21].mxu0 }
 0x551   : > { %5036 = vmatprep.subr.msk.mxu1 %vm2812_vm4, %v5768_v30 }
 0x553   : > { %5024 = vmatmul.mubr.msk.f32.vlgmr.msra.gmra.mrb[30].mxu1 %vm2491_vm3, %v5715_v22 }
 0x554   : > { %5037 = vmatpush3.msk.msra.mxu1 %vm2812_vm4, %v5768_v30 }
 0x555   : > { %5041 = vmatprep.subr.msk.mxu1 %vm2812_vm4, %v5777_v32 }
 0x55b   : > { %v5035_v40 = vpop.f32.mrb[22].mxu0 }
 0x55c   : > { %v3276_v41 = vpop.f32.mrb[23].mxu0 }
 0x55f   : > { %v5050_v51 = vpop.f32.mrb[24].mxu0 }
 0x560   : > { %v3522_v52 = vpop.f32.mrb[25].mxu0 }
 0x56b   : > { %v5065_v53 = vpop.f32.mrb[26].mxu0 }
 0x56c   : > { %v3749_v54 = vpop.f32.mrb[27].mxu0 }
 0x56f   : > { %v5080_v3 = vpop.f32.mrb[28].mxu0 }
 0x570   : > { %v3995_v4 = vpop.f32.mrb[29].mxu0 }
 0x57b   : > { %v5095_v5 = vpop.f32.mrb[30].mxu0 }
 0x57c   : > { %v4222_v6 = vpop.f32.mrb[31].mxu0 }
 0x61e   : > { %v5010_v42 = vpop.f32.mrb[26].mxu1 }
 0x61f   : > { %v2882_v43 = vpop.f32.mrb[27].mxu1 }
 0x622   : > { %v5015_v44 = vpop.f32.mrb[28].mxu1 }
 0x623   : > { %v2976_v45 = vsub.f32 %v5010_v42, %v5015_v44  ;;  %v2966_v0 = vpop.f32.mrb[29].mxu1 }
 0x624   : > { %v2975_v46 = vsub.f32 %v2882_v43, %v2966_v0 }
 0x625   : > { %2978 = vst.msk [vmem:[%s5802_s18 + $0x8] sm:$0xff] %vm522_vm1, %v2976_v45 }
 0x626   : > { %2977 = vst.msk [vmem:[%s5802_s18] sm:$0xff] %vm522_vm1, %v2975_v46  ;;  %v5025_v47 = vpop.f32.mrb[30].mxu1 }
 0x627   : > { %v3134_v48 = vsub.f32 %v5020_v11, %v5025_v47  ;;  %v3124_v49 = vpop.f32.mrb[31].mxu1 }
 0x628   : > { %v3133_v50 = vsub.f32 %v3049_v39, %v3124_v49 }
 0x62a   : > { %5038 = vmatprep.mubr.msk.f32.mxu1 %vm505_vm2, %v3133_v50 }
 0x62b   : > { %5039 = vmatmul.mubr.msk.f32.vlgmr.msra.gmra.mrb[32].mxu1 %vm505_vm2, %v3134_v48 }
 0x62c   : > { %5042 = vmatpush3.msk.msra.mxu1 %vm2812_vm4, %v5777_v32  ;;  %5043 = vmatprep.mubr.msk.f32.mxu1 %vm505_vm2, %v3276_v41 }
 0x62d   : > { %5051 = vmatprep.subr.mxu1 %v5740_v29 }
 0x62f   : > { %5044 = vmatmul.mubr.msk.f32.vlgmr.msra.gmra.mrb[34].mxu1 %vm505_vm2, %v5035_v40 }
 0x630   : > { %5052 = vmatpush3.msra.mxu1 %v5740_v29  ;;  %5053 = vmatprep.mubr.msk.f32.mxu1 %vm2491_vm3, %v5659_v27 }
 0x631   : > { %5066 = vmatprep.subr.msk.mxu1 %vm2812_vm4, %v5768_v30 }
 0x633   : > { %5054 = vmatmul.mubr.msk.f32.vlgmr.msra.gmra.mrb[36].mxu1 %vm2491_vm3, %v5715_v22 }
 0x634   : > { %5067 = vmatpush3.msk.msra.mxu1 %vm2812_vm4, %v5768_v30 }
 0x635   : > { %5071 = vmatprep.subr.msk.mxu1 %vm2812_vm4, %v5777_v32 }
 0x6fe   : > { %v5040_v55 = vpop.f32.mrb[32].mxu1 }
 0x6ff   : > { %v3357_v56 = vpop.f32.mrb[33].mxu1 }
 0x702   : > { %v5045_v57 = vpop.f32.mrb[34].mxu1 }
 0x703   : > { %v3448_v58 = vsub.f32 %v5040_v55, %v5045_v57  ;;  %v3438_v59 = vpop.f32.mrb[35].mxu1 }
 0x704   : > { %v3447_v60 = vsub.f32 %v3357_v56, %v3438_v59 }
 0x705   : > { %4637 = vst.msk [vmem:[%s5802_s18 + $0x18] sm:$0xff] %vm522_vm1, %v3448_v58 }
 0x706   : > { %4636 = vst.msk [vmem:[%s5802_s18 + $0x10] sm:$0xff] %vm522_vm1, %v3447_v60  ;;  %v5055_v61 = vpop.f32.mrb[36].mxu1 }
 0x707   : > { %v3607_v62 = vsub.f32 %v5050_v51, %v5055_v61  ;;  %v3597_v63 = vpop.f32.mrb[37].mxu1 }
 0x708   : > { %v3606_v2 = vsub.f32 %v3522_v52, %v3597_v63 }
 0x70a   : > { %5068 = vmatprep.mubr.msk.f32.mxu1 %vm505_vm2, %v3606_v2 }
 0x70b   : > { %5069 = vmatmul.mubr.msk.f32.vlgmr.msra.gmra.mrb[38].mxu1 %vm505_vm2, %v3607_v62 }
 0x70c   : > { %5072 = vmatpush3.msk.msra.mxu1 %vm2812_vm4, %v5777_v32  ;;  %5073 = vmatprep.mubr.msk.f32.mxu1 %vm505_vm2, %v3749_v54 }
 0x70d   : > { %5081 = vmatprep.subr.mxu1 %v5754_v31 }
 0x70f   : > { %5074 = vmatmul.mubr.msk.f32.vlgmr.msra.gmra.mrb[40].mxu1 %vm505_vm2, %v5065_v53 }
 0x710   : > { %5082 = vmatpush3.msra.mxu1 %v5754_v31  ;;  %5083 = vmatprep.mubr.msk.f32.mxu1 %vm2491_vm3, %v5659_v27 }
 0x711   : > { %5096 = vmatprep.subr.msk.mxu1 %vm2812_vm4, %v5768_v30 }
 0x713   : > { %5084 = vmatmul.mubr.msk.f32.vlgmr.msra.gmra.mrb[42].mxu1 %vm2491_vm3, %v5715_v22 }
 0x714   : > { %5097 = vmatpush3.msk.msra.mxu1 %vm2812_vm4, %v5768_v30 }
 0x715   : > { %5101 = vmatprep.subr.msk.mxu1 %vm2812_vm4, %v5777_v32 }
 0x7de   : > { %v5070_v7 = vpop.f32.mrb[38].mxu1 }
 0x7df   : > { %v3830_v8 = vpop.f32.mrb[39].mxu1 }
 0x7e2   : > { %v5075_v27 = vpop.f32.mrb[40].mxu1 }
 0x7e3   : > { %v3921_v13 = vsub.f32 %v5070_v7, %v5075_v27  ;;  %v3911_v14 = vpop.f32.mrb[41].mxu1 }
 0x7e4   : > { %v3920_v15 = vsub.f32 %v3830_v8, %v3911_v14 }
 0x7e5   : > { %4653 = vst.msk [vmem:[%s5802_s18 + $0x28] sm:$0xff] %vm522_vm1, %v3921_v13 }
 0x7e6   : > { %4652 = vst.msk [vmem:[%s5802_s18 + $0x20] sm:$0xff] %vm522_vm1, %v3920_v15  ;;  %v5085_v12 = vpop.f32.mrb[42].mxu1 }
 0x7e7   : > { %v4080_v16 = vsub.f32 %v5080_v3, %v5085_v12  ;;  %v4070_v17 = vpop.f32.mrb[43].mxu1 }
 0x7e8   : > { %v4079_v18 = vsub.f32 %v3995_v4, %v4070_v17 }
 0x7ea   : > { %5098 = vmatprep.mubr.msk.f32.mxu1 %vm505_vm2, %v4079_v18 }
 0x7eb   : > { %5099 = vmatmul.mubr.msk.f32.vlgmr.msra.gmra.mrb[44].mxu1 %vm505_vm2, %v4080_v16 }
 0x7ec   : > { %5103 = vmatprep.mubr.msk.f32.mxu1 %vm505_vm2, %v4222_v6  ;;  %5102 = vmatpush3.msk.msra.mxu1 %vm2812_vm4, %v5777_v32 }
 0x7ef   : > { %5104 = vmatmul.mubr.msk.f32.vlgmr.msra.gmra.mrb[46].mxu1 %vm505_vm2, %v5095_v5 }
 0x8be   : > { %v5100_v19 = vpop.f32.mrb[44].mxu1 }
 0x8bf   : > { %v4303_v20 = vpop.f32.mrb[45].mxu1 }
 0x8c2   : > { %v5105_v21 = vpop.f32.mrb[46].mxu1 }
 0x8c3   : > { %v4394_v1 = vsub.f32 %v5100_v19, %v5105_v21  ;;  %v4384_v22 = vpop.f32.mrb[47].mxu1 }
 0x8c4   : > { %v4393_v23 = vsub.f32 %v4303_v20, %v4384_v22 }
 0x8c5   : > { %4669 = vst.msk [vmem:[%s5802_s18 + $0x38] sm:$0xff] %vm522_vm1, %v4394_v1 }
 0x8c6   : > { %4668 = vst.msk [vmem:[%s5802_s18 + $0x30] sm:$0xff] %vm522_vm1, %v4393_v23 }
 0x8c7 PF: > { %s22_s23 = sadd.s32 1, %s5243_s23   ;;  %s5884_s21 = smov %s5239_s22 }
 0x8c8   : > { %p19_p5 = scmp.ge.s32.totalorder %s22_s23, 4   ;;  %s5885_s22 = smov %s5887_s24 }
 0x8ca   :  { %21 = sbr.rel (!%p19_p5) target bundleno = 2 (0x2), region = 128 }

</bundles_post_ra>
